<compile_context>
chip_gen: v7x
topology: tpu7x:2x2x1
jax: 0.10.0
libtpu: 0.0.40
codegen_flags: <defaults>
</compile_context>

<pallas_src>
import math
from functools import partial

import numpy as np
import jax
import jax.numpy as jnp
from jax.experimental import pallas as pl
from jax.experimental.pallas import tpu as pltpu


# ----------------------------------------------------------------------------
# helpers
# ----------------------------------------------------------------------------
def _sigmoid(x):
    # exp -> EUP, approx reciprocal -> EUP: keeps the VALU slots free.
    return pl.reciprocal(1.0 + jnp.exp(-x), approx=True)


def _layernorm(x, gamma, beta, eps=1e-5):
    mean = jnp.mean(x, axis=-1, keepdims=True)
    var = jnp.mean((x - mean) ** 2, axis=-1, keepdims=True)
    return (x - mean) * jax.lax.rsqrt(var + eps) * gamma + beta


# ----------------------------------------------------------------------------
# Kernel 1: pre-norm + Performer (FastAttention) self-attention + output proj
#           + residual.  One grid step = bt batch elements as (bt*N, D) rows.
# ----------------------------------------------------------------------------
def attn_kernel(x_ref, g_ref, be_ref,
                wqkv_ref, bqkv_ref, wo_ref, bo_ref, proj_ref,
                o_ref,
                *, heads, dim_head, m_real, bt, n):
    rows = bt * n
    inner = heads * dim_head

    x = x_ref[...]                                        # (rows, D)
    xn = _layernorm(x, g_ref[0], be_ref[0])

    # fused QKV projection: one (rows, D) @ (D, 3*inner) MXU pass.
    qkv = jnp.dot(xn, wqkv_ref[...],
                  preferred_element_type=jnp.float32) + bqkv_ref[0]

    proj = proj_ref[...]                                  # (dh, m_pad); dn pre-folded
    wo = wo_ref[...]                                      # (inner, D)
    m_pad = proj.shape[1]
    ratio = m_real ** (-0.5)
    diag_scale = 0.5 / math.sqrt(dim_head)                # 0.5 * data_normalizer**2
    eps = 1e-4

    # additive mask for the zero-padded performer features (m_real -> m_pad):
    # -1e30 drives exp() to 0 on key pad lanes and keeps the query row-max
    # over the real columns only.
    lane = jax.lax.broadcasted_iota(jnp.int32, (1, m_pad), 1)
    col_bias = jnp.where(lane < m_real, 0.0, -1e30).astype(jnp.float32)

    acc = jnp.zeros((rows, x.shape[1]), jnp.float32)
    for h in range(heads):
        s = h * dim_head
        qh = qkv[:, s:s + dim_head]                       # (rows, dh)
        kh = qkv[:, inner + s:inner + s + dim_head]
        vh = qkv[:, 2 * inner + s:2 * inner + s + dim_head]

        q_dash = jnp.dot(qh, proj, preferred_element_type=jnp.float32) + col_bias
        k_dash = jnp.dot(kh, proj, preferred_element_type=jnp.float32) + col_bias
        q_diag = jnp.sum(qh * qh, axis=-1, keepdims=True) * diag_scale
        k_diag = jnp.sum(kh * kh, axis=-1, keepdims=True) * diag_scale

        # softmax_kernel -- matches the torch reference exactly:
        #   query: ratio * (exp(.. - diag - rowmax) + eps)
        #   key  : ratio *  exp(.. - diag + eps)           (eps inside exp)
        qp = ratio * (jnp.exp(q_dash - q_diag
                              - jnp.max(q_dash, axis=-1, keepdims=True)) + eps)
        kp = ratio * jnp.exp(k_dash - k_diag + eps)       # pad lanes -> exp(-1e30)=0

        # linear_attention, batched over the bt batch elements of this block.
        qp3 = qp.reshape(bt, n, m_pad)
        kp3 = kp.reshape(bt, n, m_pad)
        v3 = vh.reshape(bt, n, dim_head)

        k_cumsum = jnp.sum(kp3, axis=1, keepdims=True)                     # (bt,1,m)
        d_inv = pl.reciprocal(
            jnp.sum(qp3 * k_cumsum, axis=-1, keepdims=True) + 1e-8,
            approx=True)                                                   # (bt,n,1)
        context = jax.lax.dot_general(
            kp3, v3, (((1,), (1,)), ((0,), (0,))),
            preferred_element_type=jnp.float32)                            # (bt,m,dh)
        oh = jax.lax.dot_general(
            qp3, context, (((2,), (1,)), ((0,), (0,))),
            preferred_element_type=jnp.float32) * d_inv                    # (bt,n,dh)

        # per-head accumulation through the matching rows of Wo (no concat).
        acc = acc + jnp.dot(oh.reshape(rows, dim_head), wo[s:s + dim_head, :],
                            preferred_element_type=jnp.float32)

    o_ref[...] = x + acc + bo_ref[0]                      # residual


# ----------------------------------------------------------------------------
# Kernel 2: ConformerConvModule (LN -> 1x1 conv -> GLU -> depthwise conv(31)
#           -> Swish -> 1x1 conv) + residual.  One grid step = bt batches.
# ----------------------------------------------------------------------------
def conformer_kernel(x_ref, g_ref, be_ref,
                     w1_ref, b1_ref, wd_ref, bd_ref, w2_ref, b2_ref,
                     o_ref, pad_ref,
                     *, kernel_size, pad_l, pad_r, bt, n):
    rows = bt * n
    x = x_ref[...]                                        # (rows, D)
    xn = _layernorm(x, g_ref[0], be_ref[0])

    # pointwise conv 1 (1x1 conv == matmul in time-major layout) + GLU
    y1 = jnp.dot(xn, w1_ref[...], preferred_element_type=jnp.float32) + b1_ref[0]
    c2 = y1.shape[1] // 2
    y2 = y1[:, :c2] * _sigmoid(y1[:, c2:])                # (rows, 2D)

    # depthwise conv: persistent VMEM scratch, pads zeroed in place, GLU
    # output written at a static offset -- no zeros/concat materialization.
    if pad_l > 0:
        pad_ref[:, :pad_l, :] = jnp.zeros((bt, pad_l, c2), jnp.float32)
    if pad_r > 0:
        pad_ref[:, pad_l + n:, :] = jnp.zeros((bt, pad_r, c2), jnp.float32)
    pad_ref[:, pad_l:pad_l + n, :] = y2.reshape(bt, n, c2)

    xp = pad_ref[...]                                     # (bt, n + K - 1, 2D)
    wd = wd_ref[...]                                      # (K, 2D); wd[k,c]=torch_w[c,0,k]
    acc = jnp.zeros((bt, n, c2), jnp.float32)
    for kk in range(kernel_size):                         # static-offset shifted taps
        acc = acc + xp[:, kk:kk + n, :] * wd[kk, :]
    y3 = acc.reshape(rows, c2) + bd_ref[0]

    y4 = y3 * _sigmoid(y3)                                # Swish
    y5 = jnp.dot(y4, w2_ref[...], preferred_element_type=jnp.float32) + b2_ref[0]
    o_ref[...] = x + y5                                   # residual


# ----------------------------------------------------------------------------
# wrappers
# ----------------------------------------------------------------------------
def _const_spec(shape):
    nd = len(shape)
    return pl.BlockSpec(shape, lambda i, _nd=nd: (0,) * _nd)


def _choose_bt(batch, n):
    # Batch elements per grid step: target >= 128 rows per step so the MXU M
    # dim and the per-grid-step overhead are both amortized.
    bt = min(batch, max(1, pl.cdiv(128, n)))
    while batch % bt != 0:
        bt -= 1
    return bt


def attention_block(x, p):
    B, N, D = x.shape
    heads, dim_head = p["heads"], p["dim_head"]
    inner = heads * dim_head
    m_pad = p["proj_t"].shape[1]
    bt = _choose_bt(B, N)
    rows = bt * N

    out = pl.pallas_call(
        partial(attn_kernel, heads=heads, dim_head=dim_head,
                m_real=p["m_real"], bt=bt, n=N),
        out_shape=jax.ShapeDtypeStruct((B * N, D), jnp.float32),
        grid=(B // bt,),
        in_specs=[
            pl.BlockSpec((rows, D), lambda i: (i, 0)),
            _const_spec((1, D)), _const_spec((1, D)),
            _const_spec((D, 3 * inner)), _const_spec((1, 3 * inner)),
            _const_spec((inner, D)), _const_spec((1, D)),
            _const_spec((dim_head, m_pad)),
        ],
        out_specs=pl.BlockSpec((rows, D), lambda i: (i, 0)),
        compiler_params=pltpu.CompilerParams(dimension_semantics=("parallel",)),
    )(x.reshape(B * N, D), p["ln1_g"], p["ln1_b"],
      p["wqkv_t"], p["bqkv"], p["wo_t"], p["bo"], p["proj_t"])
    return out.reshape(B, N, D)


def conformer_block(x, p):
    B, N, D = x.shape
    conv_inner = 2 * D
    K = p["wd"].shape[0]
    pad_l, pad_r = p["pad"]
    bt = _choose_bt(B, N)
    rows = bt * N

    out = pl.pallas_call(
        partial(conformer_kernel, kernel_size=K, pad_l=pad_l, pad_r=pad_r,
                bt=bt, n=N),
        out_shape=jax.ShapeDtypeStruct((B * N, D), jnp.float32),
        grid=(B // bt,),
        in_specs=[
            pl.BlockSpec((rows, D), lambda i: (i, 0)),
            _const_spec((1, D)), _const_spec((1, D)),
            _const_spec((D, 2 * conv_inner)), _const_spec((1, 2 * conv_inner)),
            _const_spec((K, conv_inner)), _const_spec((1, conv_inner)),
            _const_spec((conv_inner, D)), _const_spec((1, D)),
        ],
        out_specs=pl.BlockSpec((rows, D), lambda i: (i, 0)),
        scratch_shapes=[pltpu.VMEM((bt, N + pad_l + pad_r, conv_inner),
                                   jnp.float32)],
        compiler_params=pltpu.CompilerParams(dimension_semantics=("parallel",)),
    )(x.reshape(B * N, D), p["ln2_g"], p["ln2_b"],
      p["w1_t"], p["b1"], p["wd"], p["bd"], p["w2_t"], p["b2"])
    return out.reshape(B, N, D)


def pcmer_forward(phone, layer_params):
    # _EncoderLayer.forward: phone = phone + attn(norm(phone));
    #                        phone = phone + conformer(phone)
    for p in layer_params:
        phone = attention_block(phone, p)
        phone = conformer_block(phone, p)
    return phone


# ----------------------------------------------------------------------------
# deterministic parameter construction (synthetic; mirrors module __init__)
# ----------------------------------------------------------------------------
def gaussian_orthogonal_random_matrix_np(rng, nb_rows, nb_cols):
    nb_full = nb_rows // nb_cols
    blocks = []
    for _ in range(nb_full):
        q, _ = np.linalg.qr(rng.standard_normal((nb_cols, nb_cols)).astype(np.float32))
        blocks.append(q.T)
    rem = nb_rows - nb_full * nb_cols
    if rem > 0:
        q, _ = np.linalg.qr(rng.standard_normal((nb_cols, nb_cols)).astype(np.float32))
        blocks.append(q.T[:rem])
    final = np.concatenate(blocks, axis=0)                          # (rows, cols)
    multiplier = np.linalg.norm(
        rng.standard_normal((nb_rows, nb_cols)).astype(np.float32), axis=1)
    return (multiplier[:, None] * final).astype(np.float32)         # scaling=0


def init_layer(rng, dim, heads, dim_head, nb_features, kernel_size):
    inner = heads * dim_head
    conv_inner = 2 * dim

    def lin(shape, fan_in):
        bound = 1.0 / math.sqrt(fan_in)
        return jnp.asarray(rng.uniform(-bound, bound, size=shape).astype(np.float32))

    # Performer projection: pad nb_features to a 128 multiple (zero columns)
    # and fold the data_normalizer dh^(-1/4) into the projection once.
    proj = gaussian_orthogonal_random_matrix_np(rng, nb_features, dim_head)  # (m, dh)
    m_pad = ((nb_features + 127) // 128) * 128
    dn = dim_head ** (-0.25)
    proj_t = np.zeros((dim_head, m_pad), np.float32)
    proj_t[:, :nb_features] = proj.T * dn

    return dict(
        heads=heads, dim_head=dim_head, m_real=nb_features,
        # attention branch (Wq|Wk|Wv fused into one matmul operand)
        ln1_g=jnp.ones((1, dim), jnp.float32),
        ln1_b=jnp.zeros((1, dim), jnp.float32),
        wqkv_t=lin((dim, 3 * inner), dim), bqkv=lin((1, 3 * inner), dim),
        wo_t=lin((inner, dim), inner), bo=lin((1, dim), inner),
        proj_t=jnp.asarray(proj_t),                                  # (dh, m_pad)
        # conformer branch
        ln2_g=jnp.ones((1, dim), jnp.float32),
        ln2_b=jnp.zeros((1, dim), jnp.float32),
        w1_t=lin((dim, 2 * conv_inner), dim), b1=lin((1, 2 * conv_inner), dim),
        wd=lin((kernel_size, conv_inner), kernel_size),              # depthwise (K, C)
        bd=lin((1, conv_inner), kernel_size),
        w2_t=lin((conv_inner, dim), conv_inner), b2=lin((1, dim), conv_inner),
        pad=(kernel_size // 2, kernel_size // 2 - (kernel_size + 1) % 2),
    )


# ----------------------------------------------------------------------------
if __name__ == "__main__":
    # PCmer(num_layers=2, num_heads=2, dim_model=32, ...); dim_head fixed at 64
    # by SelfAttention, nb_features = int(64 * log(64)) = 266, conv kernel = 31.
    num_layers, num_heads, dim_model = 2, 2, 32
    dim_head = 64
    nb_features = int(dim_head * math.log(dim_head))
    kernel_size = 31
    B, N = 2, 8

    rng = np.random.default_rng(0)
    layer_params = [
        init_layer(rng, dim_model, num_heads, dim_head, nb_features, kernel_size)
        for _ in range(num_layers)
    ]

    key = jax.random.PRNGKey(0)
    phone = jax.random.normal(key, (B, N, dim_model), dtype=jnp.float32)

    out = pcmer_forward(phone, layer_params)
    out = jax.block_until_ready(out)
    assert out.shape == (B, N, dim_model) and out.dtype == jnp.float32
    assert bool(jnp.all(jnp.isfinite(out)))
    print("KERNEL_OK")
</pallas_src>

<mosaic_0001>
module attributes {stable_mosaic.version = 11 : i64} {
  func.func @attn_kernel(%arg0: i32, %arg1: memref<16x32xf32, #tpu.memory_space<vmem>>, %arg2: memref<1x32xf32, #tpu.memory_space<vmem>>, %arg3: memref<1x32xf32, #tpu.memory_space<vmem>>, %arg4: memref<32x384xf32, #tpu.memory_space<vmem>>, %arg5: memref<1x384xf32, #tpu.memory_space<vmem>>, %arg6: memref<128x32xf32, #tpu.memory_space<vmem>>, %arg7: memref<1x32xf32, #tpu.memory_space<vmem>>, %arg8: memref<64x384xf32, #tpu.memory_space<vmem>>, %arg9: memref<16x32xf32, #tpu.memory_space<vmem>>) attributes {dimension_semantics = [#tpu.dimension_semantics<parallel>], iteration_bounds = array<i64: 1>, scalar_prefetch = 0 : i64, scratch_operands = 0 : i64, tpu.core_type = #tpu.core_type<tc>, window_params = [{transform_indices = @transform_0, window_bounds = array<i64: 16, 32>}, {pipeline_mode = #tpu.pipeline_mode<synchronous>, transform_indices = @transform_1, window_bounds = array<i64: 1, 32>}, {pipeline_mode = #tpu.pipeline_mode<synchronous>, transform_indices = @transform_2, window_bounds = array<i64: 1, 32>}, {pipeline_mode = #tpu.pipeline_mode<synchronous>, transform_indices = @transform_3, window_bounds = array<i64: 32, 384>}, {pipeline_mode = #tpu.pipeline_mode<synchronous>, transform_indices = @transform_4, window_bounds = array<i64: 1, 384>}, {pipeline_mode = #tpu.pipeline_mode<synchronous>, transform_indices = @transform_5, window_bounds = array<i64: 128, 32>}, {pipeline_mode = #tpu.pipeline_mode<synchronous>, transform_indices = @transform_6, window_bounds = array<i64: 1, 32>}, {pipeline_mode = #tpu.pipeline_mode<synchronous>, transform_indices = @transform_7, window_bounds = array<i64: 64, 384>}, {transform_indices = @transform_8, window_bounds = array<i64: 16, 32>}]} {
    %c0 = arith.constant 0 : index
    %c0_0 = arith.constant 0 : index
    %0 = vector.load %arg1[%c0, %c0_0] : memref<16x32xf32, #tpu.memory_space<vmem>>, vector<16x32xf32>
    %c0_1 = arith.constant 0 : index
    %c0_2 = arith.constant 0 : index
    %1 = vector.load %arg2[%c0_1, %c0_2] : memref<1x32xf32, #tpu.memory_space<vmem>>, vector<1x32xf32>
    %2 = vector.shape_cast %1 : vector<1x32xf32> to vector<32xf32>
    %c0_3 = arith.constant 0 : index
    %c0_4 = arith.constant 0 : index
    %3 = vector.load %arg3[%c0_3, %c0_4] : memref<1x32xf32, #tpu.memory_space<vmem>>, vector<1x32xf32>
    %4 = vector.shape_cast %3 : vector<1x32xf32> to vector<32xf32>
    %cst = arith.constant dense<0.000000e+00> : vector<16xf32>
    %5 = vector.multi_reduction <add>, %0, %cst [1] : vector<16x32xf32> to vector<16xf32>
    %6 = vector.shape_cast %5 : vector<16xf32> to vector<16x1xf32>
    %cst_5 = arith.constant 3.200000e+01 : f32
    %7 = vector.broadcast %cst_5 : f32 to vector<16x1xf32>
    %8 = arith.divf %6, %7 : vector<16x1xf32>
    %9 = vector.broadcast %8 : vector<16x1xf32> to vector<16x32xf32>
    %10 = arith.subf %0, %9 : vector<16x32xf32>
    %11 = arith.mulf %10, %10 : vector<16x32xf32>
    %cst_6 = arith.constant dense<0.000000e+00> : vector<16xf32>
    %12 = vector.multi_reduction <add>, %11, %cst_6 [1] : vector<16x32xf32> to vector<16xf32>
    %13 = vector.shape_cast %12 : vector<16xf32> to vector<16x1xf32>
    %cst_7 = arith.constant 3.200000e+01 : f32
    %14 = vector.broadcast %cst_7 : f32 to vector<16x1xf32>
    %15 = arith.divf %13, %14 : vector<16x1xf32>
    %16 = vector.broadcast %8 : vector<16x1xf32> to vector<16x32xf32>
    %17 = arith.subf %0, %16 : vector<16x32xf32>
    %cst_8 = arith.constant 9.99999974E-6 : f32
    %18 = vector.broadcast %cst_8 : f32 to vector<16x1xf32>
    %19 = arith.addf %15, %18 : vector<16x1xf32>
    %20 = math.rsqrt %19 : vector<16x1xf32>
    %21 = vector.broadcast %20 : vector<16x1xf32> to vector<16x32xf32>
    %22 = arith.mulf %17, %21 : vector<16x32xf32>
    %23 = vector.shape_cast %2 : vector<32xf32> to vector<1x32xf32>
    %24 = vector.broadcast %23 : vector<1x32xf32> to vector<16x32xf32>
    %25 = arith.mulf %22, %24 : vector<16x32xf32>
    %26 = vector.shape_cast %4 : vector<32xf32> to vector<1x32xf32>
    %27 = vector.broadcast %26 : vector<1x32xf32> to vector<16x32xf32>
    %28 = arith.addf %25, %27 : vector<16x32xf32>
    %c0_9 = arith.constant 0 : index
    %c0_10 = arith.constant 0 : index
    %29 = vector.load %arg4[%c0_9, %c0_10] : memref<32x384xf32, #tpu.memory_space<vmem>>, vector<32x384xf32>
    %cst_11 = arith.constant dense<0.000000e+00> : vector<16x384xf32>
    %30 = tpu.matmul %28, %29, %cst_11 {dimension_numbers = #tpu.dot_dimension_numbers<[1], [0], [0], [1], [0, 0, 1, 1], [], []>} : vector<16x32xf32>, vector<32x384xf32>, vector<16x384xf32> -> vector<16x384xf32>
    %c0_12 = arith.constant 0 : index
    %c0_13 = arith.constant 0 : index
    %31 = vector.load %arg5[%c0_12, %c0_13] : memref<1x384xf32, #tpu.memory_space<vmem>>, vector<1x384xf32>
    %32 = vector.shape_cast %31 : vector<1x384xf32> to vector<384xf32>
    %33 = vector.shape_cast %32 : vector<384xf32> to vector<1x384xf32>
    %34 = vector.broadcast %33 : vector<1x384xf32> to vector<16x384xf32>
    %35 = arith.addf %30, %34 : vector<16x384xf32>
    %c0_14 = arith.constant 0 : index
    %c0_15 = arith.constant 0 : index
    %36 = vector.load %arg8[%c0_14, %c0_15] : memref<64x384xf32, #tpu.memory_space<vmem>>, vector<64x384xf32>
    %c0_16 = arith.constant 0 : index
    %c0_17 = arith.constant 0 : index
    %37 = vector.load %arg6[%c0_16, %c0_17] : memref<128x32xf32, #tpu.memory_space<vmem>>, vector<128x32xf32>
    %38 = tpu.iota {dimensions = array<i32: 1>} : vector<1x384xi32>
    %c266_i32 = arith.constant 266 : i32
    %39 = vector.broadcast %c266_i32 : i32 to vector<1x384xi32>
    %40 = arith.cmpi slt, %38, %39 : vector<1x384xi32>
    %cst_18 = arith.constant 0.000000e+00 : f32
    %cst_19 = arith.constant -1.000000e+30 : f32
    %41 = vector.broadcast %cst_18 : f32 to vector<1x384xf32>
    %42 = vector.broadcast %cst_19 : f32 to vector<1x384xf32>
    %43 = arith.select %40, %41, %42 : vector<1x384xi1>, vector<1x384xf32>
    %cst_20 = arith.constant 0.000000e+00 : f32
    %44 = vector.broadcast %cst_20 : f32 to vector<16x32xf32>
    %45 = vector.extract_strided_slice %35 {offsets = [0, 0], sizes = [16, 64], strides = [1, 1]} : vector<16x384xf32> to vector<16x64xf32>
    %46 = vector.extract_strided_slice %35 {offsets = [0, 128], sizes = [16, 64], strides = [1, 1]} : vector<16x384xf32> to vector<16x64xf32>
    %47 = vector.extract_strided_slice %35 {offsets = [0, 256], sizes = [16, 64], strides = [1, 1]} : vector<16x384xf32> to vector<16x64xf32>
    %cst_21 = arith.constant dense<0.000000e+00> : vector<16x384xf32>
    %48 = tpu.matmul %45, %36, %cst_21 {dimension_numbers = #tpu.dot_dimension_numbers<[1], [0], [0], [1], [0, 0, 1, 1], [], []>} : vector<16x64xf32>, vector<64x384xf32>, vector<16x384xf32> -> vector<16x384xf32>
    %49 = vector.broadcast %43 : vector<1x384xf32> to vector<16x384xf32>
    %50 = arith.addf %48, %49 : vector<16x384xf32>
    %cst_22 = arith.constant dense<0.000000e+00> : vector<16x384xf32>
    %51 = tpu.matmul %46, %36, %cst_22 {dimension_numbers = #tpu.dot_dimension_numbers<[1], [0], [0], [1], [0, 0, 1, 1], [], []>} : vector<16x64xf32>, vector<64x384xf32>, vector<16x384xf32> -> vector<16x384xf32>
    %52 = vector.broadcast %43 : vector<1x384xf32> to vector<16x384xf32>
    %53 = arith.addf %51, %52 : vector<16x384xf32>
    %54 = arith.mulf %45, %45 : vector<16x64xf32>
    %cst_23 = arith.constant dense<0.000000e+00> : vector<16xf32>
    %55 = vector.multi_reduction <add>, %54, %cst_23 [1] : vector<16x64xf32> to vector<16xf32>
    %56 = vector.shape_cast %55 : vector<16xf32> to vector<16x1xf32>
    %cst_24 = arith.constant 6.250000e-02 : f32
    %57 = vector.broadcast %cst_24 : f32 to vector<16x1xf32>
    %58 = arith.mulf %56, %57 : vector<16x1xf32>
    %59 = arith.mulf %46, %46 : vector<16x64xf32>
    %cst_25 = arith.constant dense<0.000000e+00> : vector<16xf32>
    %60 = vector.multi_reduction <add>, %59, %cst_25 [1] : vector<16x64xf32> to vector<16xf32>
    %61 = vector.shape_cast %60 : vector<16xf32> to vector<16x1xf32>
    %cst_26 = arith.constant 6.250000e-02 : f32
    %62 = vector.broadcast %cst_26 : f32 to vector<16x1xf32>
    %63 = arith.mulf %61, %62 : vector<16x1xf32>
    %64 = vector.broadcast %58 : vector<16x1xf32> to vector<16x384xf32>
    %65 = arith.subf %50, %64 : vector<16x384xf32>
    %cst_27 = arith.constant dense<0xFF800000> : vector<16xf32>
    %66 = vector.multi_reduction <maximumf>, %50, %cst_27 [1] : vector<16x384xf32> to vector<16xf32>
    %67 = vector.shape_cast %66 : vector<16xf32> to vector<16x1xf32>
    %68 = vector.broadcast %67 : vector<16x1xf32> to vector<16x384xf32>
    %69 = arith.subf %65, %68 : vector<16x384xf32>
    %70 = math.exp %69 : vector<16x384xf32>
    %cst_28 = arith.constant 9.99999974E-5 : f32
    %71 = vector.broadcast %cst_28 : f32 to vector<16x384xf32>
    %72 = arith.addf %70, %71 : vector<16x384xf32>
    %cst_29 = arith.constant 0.0613139346 : f32
    %73 = vector.broadcast %cst_29 : f32 to vector<16x384xf32>
    %74 = arith.mulf %73, %72 : vector<16x384xf32>
    %75 = vector.broadcast %63 : vector<16x1xf32> to vector<16x384xf32>
    %76 = arith.subf %53, %75 : vector<16x384xf32>
    %cst_30 = arith.constant 9.99999974E-5 : f32
    %77 = vector.broadcast %cst_30 : f32 to vector<16x384xf32>
    %78 = arith.addf %76, %77 : vector<16x384xf32>
    %79 = math.exp %78 : vector<16x384xf32>
    %cst_31 = arith.constant 0.0613139346 : f32
    %80 = vector.broadcast %cst_31 : f32 to vector<16x384xf32>
    %81 = arith.mulf %80, %79 : vector<16x384xf32>
    %82 = vector.shape_cast %74 : vector<16x384xf32> to vector<2x8x384xf32>
    %83 = vector.shape_cast %81 : vector<16x384xf32> to vector<2x8x384xf32>
    %84 = vector.shape_cast %47 : vector<16x64xf32> to vector<2x8x64xf32>
    %cst_32 = arith.constant dense<0.000000e+00> : vector<2x384xf32>
    %85 = vector.multi_reduction <add>, %83, %cst_32 [1] : vector<2x8x384xf32> to vector<2x384xf32>
    %86 = vector.shape_cast %85 : vector<2x384xf32> to vector<2x1x384xf32>
    %87 = vector.broadcast %86 : vector<2x1x384xf32> to vector<2x8x384xf32>
    %88 = arith.mulf %82, %87 : vector<2x8x384xf32>
    %cst_33 = arith.constant dense<0.000000e+00> : vector<2x8xf32>
    %89 = vector.multi_reduction <add>, %88, %cst_33 [2] : vector<2x8x384xf32> to vector<2x8xf32>
    %90 = vector.shape_cast %89 : vector<2x8xf32> to vector<2x8x1xf32>
    %cst_34 = arith.constant 9.99999993E-9 : f32
    %91 = vector.broadcast %cst_34 : f32 to vector<2x8x1xf32>
    %92 = arith.addf %90, %91 : vector<2x8x1xf32>
    %93 = tpu.reciprocal %92 {approx = true} : vector<2x8x1xf32> -> vector<2x8x1xf32>
    %cst_35 = arith.constant dense<0.000000e+00> : vector<2x384x64xf32>
    %94 = tpu.matmul %83, %84, %cst_35 {dimension_numbers = #tpu.dot_dimension_numbers<[1], [1], [2], [2], [0, 0, 0, 2, 1, 2], [0], [0]>} : vector<2x8x384xf32>, vector<2x8x64xf32>, vector<2x384x64xf32> -> vector<2x384x64xf32>
    %cst_36 = arith.constant dense<0.000000e+00> : vector<2x8x64xf32>
    %95 = tpu.matmul %82, %94, %cst_36 {dimension_numbers = #tpu.dot_dimension_numbers<[2], [1], [1], [2], [0, 0, 0, 1, 1, 2], [0], [0]>} : vector<2x8x384xf32>, vector<2x384x64xf32>, vector<2x8x64xf32> -> vector<2x8x64xf32>
    %96 = vector.broadcast %93 : vector<2x8x1xf32> to vector<2x8x64xf32>
    %97 = arith.mulf %95, %96 : vector<2x8x64xf32>
    %98 = vector.shape_cast %97 : vector<2x8x64xf32> to vector<16x64xf32>
    %99 = vector.extract_strided_slice %37 {offsets = [0, 0], sizes = [64, 32], strides = [1, 1]} : vector<128x32xf32> to vector<64x32xf32>
    %cst_37 = arith.constant dense<0.000000e+00> : vector<16x32xf32>
    %100 = tpu.matmul %98, %99, %cst_37 {dimension_numbers = #tpu.dot_dimension_numbers<[1], [0], [0], [1], [0, 0, 1, 1], [], []>} : vector<16x64xf32>, vector<64x32xf32>, vector<16x32xf32> -> vector<16x32xf32>
    %101 = arith.addf %44, %100 : vector<16x32xf32>
    %102 = vector.extract_strided_slice %35 {offsets = [0, 64], sizes = [16, 64], strides = [1, 1]} : vector<16x384xf32> to vector<16x64xf32>
    %103 = vector.extract_strided_slice %35 {offsets = [0, 192], sizes = [16, 64], strides = [1, 1]} : vector<16x384xf32> to vector<16x64xf32>
    %104 = vector.extract_strided_slice %35 {offsets = [0, 320], sizes = [16, 64], strides = [1, 1]} : vector<16x384xf32> to vector<16x64xf32>
    %cst_38 = arith.constant dense<0.000000e+00> : vector<16x384xf32>
    %105 = tpu.matmul %102, %36, %cst_38 {dimension_numbers = #tpu.dot_dimension_numbers<[1], [0], [0], [1], [0, 0, 1, 1], [], []>} : vector<16x64xf32>, vector<64x384xf32>, vector<16x384xf32> -> vector<16x384xf32>
    %106 = vector.broadcast %43 : vector<1x384xf32> to vector<16x384xf32>
    %107 = arith.addf %105, %106 : vector<16x384xf32>
    %cst_39 = arith.constant dense<0.000000e+00> : vector<16x384xf32>
    %108 = tpu.matmul %103, %36, %cst_39 {dimension_numbers = #tpu.dot_dimension_numbers<[1], [0], [0], [1], [0, 0, 1, 1], [], []>} : vector<16x64xf32>, vector<64x384xf32>, vector<16x384xf32> -> vector<16x384xf32>
    %109 = vector.broadcast %43 : vector<1x384xf32> to vector<16x384xf32>
    %110 = arith.addf %108, %109 : vector<16x384xf32>
    %111 = arith.mulf %102, %102 : vector<16x64xf32>
    %cst_40 = arith.constant dense<0.000000e+00> : vector<16xf32>
    %112 = vector.multi_reduction <add>, %111, %cst_40 [1] : vector<16x64xf32> to vector<16xf32>
    %113 = vector.shape_cast %112 : vector<16xf32> to vector<16x1xf32>
    %cst_41 = arith.constant 6.250000e-02 : f32
    %114 = vector.broadcast %cst_41 : f32 to vector<16x1xf32>
    %115 = arith.mulf %113, %114 : vector<16x1xf32>
    %116 = arith.mulf %103, %103 : vector<16x64xf32>
    %cst_42 = arith.constant dense<0.000000e+00> : vector<16xf32>
    %117 = vector.multi_reduction <add>, %116, %cst_42 [1] : vector<16x64xf32> to vector<16xf32>
    %118 = vector.shape_cast %117 : vector<16xf32> to vector<16x1xf32>
    %cst_43 = arith.constant 6.250000e-02 : f32
    %119 = vector.broadcast %cst_43 : f32 to vector<16x1xf32>
    %120 = arith.mulf %118, %119 : vector<16x1xf32>
    %121 = vector.broadcast %115 : vector<16x1xf32> to vector<16x384xf32>
    %122 = arith.subf %107, %121 : vector<16x384xf32>
    %cst_44 = arith.constant dense<0xFF800000> : vector<16xf32>
    %123 = vector.multi_reduction <maximumf>, %107, %cst_44 [1] : vector<16x384xf32> to vector<16xf32>
    %124 = vector.shape_cast %123 : vector<16xf32> to vector<16x1xf32>
    %125 = vector.broadcast %124 : vector<16x1xf32> to vector<16x384xf32>
    %126 = arith.subf %122, %125 : vector<16x384xf32>
    %127 = math.exp %126 : vector<16x384xf32>
    %cst_45 = arith.constant 9.99999974E-5 : f32
    %128 = vector.broadcast %cst_45 : f32 to vector<16x384xf32>
    %129 = arith.addf %127, %128 : vector<16x384xf32>
    %cst_46 = arith.constant 0.0613139346 : f32
    %130 = vector.broadcast %cst_46 : f32 to vector<16x384xf32>
    %131 = arith.mulf %130, %129 : vector<16x384xf32>
    %132 = vector.broadcast %120 : vector<16x1xf32> to vector<16x384xf32>
    %133 = arith.subf %110, %132 : vector<16x384xf32>
    %cst_47 = arith.constant 9.99999974E-5 : f32
    %134 = vector.broadcast %cst_47 : f32 to vector<16x384xf32>
    %135 = arith.addf %133, %134 : vector<16x384xf32>
    %136 = math.exp %135 : vector<16x384xf32>
    %cst_48 = arith.constant 0.0613139346 : f32
    %137 = vector.broadcast %cst_48 : f32 to vector<16x384xf32>
    %138 = arith.mulf %137, %136 : vector<16x384xf32>
    %139 = vector.shape_cast %131 : vector<16x384xf32> to vector<2x8x384xf32>
    %140 = vector.shape_cast %138 : vector<16x384xf32> to vector<2x8x384xf32>
    %141 = vector.shape_cast %104 : vector<16x64xf32> to vector<2x8x64xf32>
    %cst_49 = arith.constant dense<0.000000e+00> : vector<2x384xf32>
    %142 = vector.multi_reduction <add>, %140, %cst_49 [1] : vector<2x8x384xf32> to vector<2x384xf32>
    %143 = vector.shape_cast %142 : vector<2x384xf32> to vector<2x1x384xf32>
    %144 = vector.broadcast %143 : vector<2x1x384xf32> to vector<2x8x384xf32>
    %145 = arith.mulf %139, %144 : vector<2x8x384xf32>
    %cst_50 = arith.constant dense<0.000000e+00> : vector<2x8xf32>
    %146 = vector.multi_reduction <add>, %145, %cst_50 [2] : vector<2x8x384xf32> to vector<2x8xf32>
    %147 = vector.shape_cast %146 : vector<2x8xf32> to vector<2x8x1xf32>
    %cst_51 = arith.constant 9.99999993E-9 : f32
    %148 = vector.broadcast %cst_51 : f32 to vector<2x8x1xf32>
    %149 = arith.addf %147, %148 : vector<2x8x1xf32>
    %150 = tpu.reciprocal %149 {approx = true} : vector<2x8x1xf32> -> vector<2x8x1xf32>
    %cst_52 = arith.constant dense<0.000000e+00> : vector<2x384x64xf32>
    %151 = tpu.matmul %140, %141, %cst_52 {dimension_numbers = #tpu.dot_dimension_numbers<[1], [1], [2], [2], [0, 0, 0, 2, 1, 2], [0], [0]>} : vector<2x8x384xf32>, vector<2x8x64xf32>, vector<2x384x64xf32> -> vector<2x384x64xf32>
    %cst_53 = arith.constant dense<0.000000e+00> : vector<2x8x64xf32>
    %152 = tpu.matmul %139, %151, %cst_53 {dimension_numbers = #tpu.dot_dimension_numbers<[2], [1], [1], [2], [0, 0, 0, 1, 1, 2], [0], [0]>} : vector<2x8x384xf32>, vector<2x384x64xf32>, vector<2x8x64xf32> -> vector<2x8x64xf32>
    %153 = vector.broadcast %150 : vector<2x8x1xf32> to vector<2x8x64xf32>
    %154 = arith.mulf %152, %153 : vector<2x8x64xf32>
    %155 = vector.shape_cast %154 : vector<2x8x64xf32> to vector<16x64xf32>
    %156 = vector.extract_strided_slice %37 {offsets = [64, 0], sizes = [64, 32], strides = [1, 1]} : vector<128x32xf32> to vector<64x32xf32>
    %cst_54 = arith.constant dense<0.000000e+00> : vector<16x32xf32>
    %157 = tpu.matmul %155, %156, %cst_54 {dimension_numbers = #tpu.dot_dimension_numbers<[1], [0], [0], [1], [0, 0, 1, 1], [], []>} : vector<16x64xf32>, vector<64x32xf32>, vector<16x32xf32> -> vector<16x32xf32>
    %158 = arith.addf %101, %157 : vector<16x32xf32>
    %159 = arith.addf %0, %158 : vector<16x32xf32>
    %c0_55 = arith.constant 0 : index
    %c0_56 = arith.constant 0 : index
    %160 = vector.load %arg7[%c0_55, %c0_56] : memref<1x32xf32, #tpu.memory_space<vmem>>, vector<1x32xf32>
    %161 = vector.shape_cast %160 : vector<1x32xf32> to vector<32xf32>
    %162 = vector.shape_cast %161 : vector<32xf32> to vector<1x32xf32>
    %163 = vector.broadcast %162 : vector<1x32xf32> to vector<16x32xf32>
    %164 = arith.addf %159, %163 : vector<16x32xf32>
    %c0_57 = arith.constant 0 : index
    %c0_58 = arith.constant 0 : index
    %165 = vector.load %arg9[%c0_57, %c0_58] : memref<16x32xf32, #tpu.memory_space<vmem>>, vector<16x32xf32>
    tpu.vector_store %arg9[%c0_57, %c0_58], %164 {strides = array<i32>} : memref<16x32xf32, #tpu.memory_space<vmem>>, vector<16x32xf32>,
    return
  }
  func.func @transform_0(%arg0: i32) -> (i32, i32) {
    %c0_i32 = arith.constant 0 : i32
    %c0_i32_0 = arith.constant 0 : i32
    return %arg0, %c0_i32 : i32, i32
  }
  func.func @transform_1(%arg0: i32) -> (i32, i32) {
    %c0_i32 = arith.constant 0 : i32
    %c0_i32_0 = arith.constant 0 : i32
    %c0_i32_1 = arith.constant 0 : i32
    return %c0_i32, %c0_i32_0 : i32, i32
  }
  func.func @transform_2(%arg0: i32) -> (i32, i32) {
    %c0_i32 = arith.constant 0 : i32
    %c0_i32_0 = arith.constant 0 : i32
    %c0_i32_1 = arith.constant 0 : i32
    return %c0_i32, %c0_i32_0 : i32, i32
  }
  func.func @transform_3(%arg0: i32) -> (i32, i32) {
    %c0_i32 = arith.constant 0 : i32
    %c0_i32_0 = arith.constant 0 : i32
    %c0_i32_1 = arith.constant 0 : i32
    return %c0_i32, %c0_i32_0 : i32, i32
  }
  func.func @transform_4(%arg0: i32) -> (i32, i32) {
    %c0_i32 = arith.constant 0 : i32
    %c0_i32_0 = arith.constant 0 : i32
    %c0_i32_1 = arith.constant 0 : i32
    return %c0_i32, %c0_i32_0 : i32, i32
  }
  func.func @transform_5(%arg0: i32) -> (i32, i32) {
    %c0_i32 = arith.constant 0 : i32
    %c0_i32_0 = arith.constant 0 : i32
    %c0_i32_1 = arith.constant 0 : i32
    return %c0_i32, %c0_i32_0 : i32, i32
  }
  func.func @transform_6(%arg0: i32) -> (i32, i32) {
    %c0_i32 = arith.constant 0 : i32
    %c0_i32_0 = arith.constant 0 : i32
    %c0_i32_1 = arith.constant 0 : i32
    return %c0_i32, %c0_i32_0 : i32, i32
  }
  func.func @transform_7(%arg0: i32) -> (i32, i32) {
    %c0_i32 = arith.constant 0 : i32
    %c0_i32_0 = arith.constant 0 : i32
    %c0_i32_1 = arith.constant 0 : i32
    return %c0_i32, %c0_i32_0 : i32, i32
  }
  func.func @transform_8(%arg0: i32) -> (i32, i32) {
    %c0_i32 = arith.constant 0 : i32
    %c0_i32_0 = arith.constant 0 : i32
    return %arg0, %c0_i32 : i32, i32
  }
}

</mosaic_0001>

<bundles_post_ra>
// kernel: tpu_custom_call.1
= control target key start
LH: loop header
LB: loop body
LE: loop exit
PB: predicated region body
PF: predicated region fallthrough
CT: control target
= control target key end

     0   :  { %13 = vsyncpa [#allocation3], 0  ;;  %s7025_s0 = inlined_call_operand.vmem [shape: f32[16,32], index: 0, kind: input, shape index: {}]   ;;  %s7026_s1 = inlined_call_operand.vmem [shape: f32[1,32], index: 1, kind: input, shape index: {}]   ;;  %s7027_s2 = inlined_call_operand.vmem [shape: f32[1,32], index: 2, kind: input, shape index: {}]   ;;  %s7028_s3 = inlined_call_operand.vmem [shape: f32[32,384], index: 3, kind: input, shape index: {}]   ;;  %s7029_s4 = inlined_call_operand.vmem [shape: f32[1,384], index: 4, kind: input, shape index: {}]   ;;  %s7030_s5 = inlined_call_operand.vmem [shape: f32[128,32], index: 5, kind: input, shape index: {}]   ;;  %s7031_s6 = inlined_call_operand.vmem [shape: f32[1,32], index: 6, kind: input, shape index: {}]   ;;  %s7032_s7 = inlined_call_operand.hbm [shape: f32[64,384], index: 7, kind: input, shape index: {}]   ;;  %s7033_s8 = inlined_call_operand.hbm [shape: f32[16,32], index: 8, kind: output, shape index: {}]  }
   0x1   :  { %14 = vsyncpa [#allocation4], 0  ;;  %s5992_s27 = smov [#allocation2]   ;;  %s5944_s9 = scalar_lea.hbm %s7032_s7, 3072 }
   0x2   :  { %s34_s28 = sshll.u32 %s5992_s27, 4  ;;  %p5945_p0 = scmp.ne.s32.totalorder %s7032_s7, %s5944_s9  ;;  %s35_s28 = int_to_ptr.vmem [resolvable:$true] %s34_s28 }
   0x3   :  { %p5948_p1 = scmp.lt.u32.totalorder %s5944_s9, %s7032_s7 }
   0x5   :  { %p5950_p2 = pnand %p5948_p1, %p5945_p0 }
   0x7   :  { %5953 = shalt.err (!%p5950_p2)
}
   0x8   :  { %s5954_s14 = scalar_lea.vmem %s35_s28, 3072  ;;  %p5959_p4 = scmp.lt.s32.totalorder %s35_s28, %s35_s28 }
   0x9   :  { %p5955_p3 = scmp.ne.s32.totalorder %s35_s28, %s5954_s14  ;;  %p5960_p5 = scmp.lt.s32.totalorder %s5954_s14, %s5954_s14 }
   0xb   :  { %p5961_p6 = por %p5960_p5, %p5959_p4 }
   0xd   :  { %p5962_p7 = pnand %p5961_p6, %p5955_p3 }
   0xf   :  { %5965 = shalt.err (!%p5962_p7)
}
  0x10   :  { %s5993_s15 = smov 384   ;;  %s5994_s16 = smov 24  }
  0x11   :  { %40 = dma.hbm_to_vmem [thread:$0]  %s7032_s7, 3072, %s35_s28, [#allocation3], %s5993_s15, %s5993_s15, %s5994_s16  }
  0x12   :  { %5988 = dma.done.wait [#allocation3], 3072  }
  0x13   :  { %5989 = vsyncadd [#allocation3], 4294964224  ;;  %vm48_vm0 = vcmask 261120   ;;  %v44_v0 = vld [vmem:[%s7025_s0] sm:$0xff]  ;;  %v45_v1 = vld [vmem:[%s7025_s0 + $0x8] sm:$0xff]  ;;  %v7036_v21 = vmov 0.0  }
  0x14   :  { %v49_v2 = vsel %vm48_vm0, %v44_v0, 0.0  ;;  %v52_v3 = vsel %vm48_vm0, %v45_v1, 0.0  ;;  %v93_v14 = vld [vmem:[%s7028_s3 + $0x8] sm:$0xff]  ;;  %v96_v15 = vld [vmem:[%s7028_s3 + $0x20] sm:$0xff]  ;;  %v95_v18 = vld [vmem:[%s7028_s3 + $0x18] sm:$0xff]  ;;  %191 = vmatprep.mubr.f32.mxu0 %v7036_v21  ;;  %vm329_vm1 = vcmask 523264  }
  0x15   :  { %50 = vadd.xlane.f32.xlu0 %v49_v2  ;;  %v92_v16 = vld [vmem:[%s7028_s3] sm:$0xff]  ;;  %v5469_v17 = vpack.c.bf16 %v96_v15, %v93_v14  ;;  %v99_v19 = vld [vmem:[%s7028_s3 + $0x38] sm:$0xff]  ;;  %v102_v20 = vld [vmem:[%s7028_s3 + $0x50] sm:$0xff]  ;;  %vm890_vm3 = vcmask 64512   ;;  %vm5999_vm4 = vmmov 0  }
  0x16   :  { %v5471_v22 = vpack.c.bf16 %v95_v18, %v92_v16  ;;  %v5473_v23 = vpack.c.bf16 %v102_v20, %v99_v19  ;;  %v94_v24 = vld [vmem:[%s7028_s3 + $0x10] sm:$0xff]  ;;  %v97_v25 = vld [vmem:[%s7028_s3 + $0x28] sm:$0xff]  ;;  %v100_v30 = vld [vmem:[%s7028_s3 + $0x40] sm:$0xff] }
  0x17   :  { %v98_v26 = vld [vmem:[%s7028_s3 + $0x30] sm:$0xff]  ;;  %5470 = vmatprep.subr.bf16.mxu0 %v5469_v17  ;;  %v5477_v27 = vpack.c.bf16 %v97_v25, %v94_v24  ;;  %v101_v28 = vld [vmem:[%s7028_s3 + $0x48] sm:$0xff]  ;;  %v103_v31 = vld [vmem:[%s7028_s3 + $0x58] sm:$0xff] }
  0x18   :  { %5472 = vmatpush1.bf16.msra.mxu0 %v5471_v22  ;;  %v5475_v29 = vpack.c.bf16 %v101_v28, %v98_v26  ;;  %v5481_v32 = vpack.c.bf16 %v103_v31, %v100_v30  ;;  %v280_v33 = vld [vmem:[#allocation2 + $0x8] sm:$0xff]  ;;  %v283_v34 = vld [vmem:[#allocation2 + $0x20] sm:$0xff]  ;;  %v282_v48 = vld [vmem:[#allocation2 + $0x18] sm:$0xff] }
  0x19   :  { %53 = vadd.xlane.f32.xlu0 %v52_v3  ;;  %5474 = vmatprep.subr.bf16.mxu0 %v5473_v23  ;;  %v6107_v35 = vpack.c.bf16 %v283_v34, %v280_v33  ;;  %v4219_v43 = vld [vmem:[%s7026_s1] ss:$0 sm:$0xff]  ;;  %v286_v50 = vld [vmem:[#allocation2 + $0x38] sm:$0xff]  ;;  %v289_v51 = vld [vmem:[#allocation2 + $0x50] sm:$0xff] }
  0x1a   :  { %5478 = vmatprep.subr.bf16.mxu1 %v5477_v27  ;;  %v4220_v45 = vld [vmem:[%s7027_s2] ss:$0 sm:$0xff]  ;;  %v6121_v56 = vpack.c.bf16 %v289_v51, %v286_v50  ;;  %v285_v57 = vld [vmem:[#allocation2 + $0x30] sm:$0xff]  ;;  %v288_v58 = vld [vmem:[#allocation2 + $0x48] sm:$0xff] }
  0x1b   :  { %5480 = vmatpush3.bf16.msra.mxu1 %v5477_v27  ;;  %v279_v47 = vld [vmem:[#allocation2] sm:$0xff]  ;;  %v292_v59 = vld [vmem:[#allocation2 + $0x68] sm:$0xff]  ;;  %v6126_v62 = vpack.c.bf16 %v288_v58, %v285_v57  ;;  %v298_v2 = vld [vmem:[#allocation2 + $0x98] sm:$0xff] }
  0x1c   :  { %5476 = vmatpush1.bf16.msra.mxu0 %v5475_v29  ;;  %5482 = vmatprep.subr.bf16.mxu1 %v5481_v32  ;;  %v6117_v54 = vpack.c.bf16 %v282_v48, %v279_v47  ;;  %v295_v60 = vld [vmem:[#allocation2 + $0x80] sm:$0xff]  ;;  %v301_v3 = vld [vmem:[#allocation2 + $0xb0] sm:$0xff]  ;;  %v290_v22 = vld [vmem:[#allocation2 + $0x58] sm:$0xff] }
  0x1d   :  { %5518 = vmatprep.subr.bf16.mxu0 %v6107_v35  ;;  %v6130_v63 = vpack.c.bf16 %v295_v60, %v292_v59  ;;  %v104_v15 = vld [vmem:[%s7029_s4] sm:$0x7]  ;;  %v293_v29 = vld [vmem:[#allocation2 + $0x70] sm:$0xff]  ;;  %v296_v30 = vld [vmem:[#allocation2 + $0x88] sm:$0xff]  ;;  %s5997_s4 = smov 64  }
  0x1e   :  { %v287_v20 = vld [vmem:[#allocation2 + $0x40] sm:$0xff] }
  0x1f   :  { %5484 = vmatpush3.bf16.msra.mxu1 %v5481_v32  ;;  %v6161_v27 = vpack.c.bf16 %v290_v22, %v287_v20 }
  0x20   :  { %5486 = vmatprep.subr.bf16.mxu1 %v6107_v35 }
  0xa2   :  { %v51_v4 = vpop.xlane.xlu0 %50 }
  0xa3   :  { %v56_v5 = vmul.f32 0.03125, %v51_v4 }
  0xa5   :  { %v58_v6 = vsub.f32 %v44_v0, %v56_v5  ;;  %v291_v0 = vld [vmem:[#allocation2 + $0x60] sm:$0xff]  ;;  %v6140_v5 = vpack.c.bf16 %v301_v3, %v298_v2 }
  0xa6   :  { %v54_v7 = vpop.xlane.xlu0 %53 }
  0xa7   :  { %v57_v8 = vmul.f32 0.03125, %v54_v7  ;;  %v60_v9 = vmul.f32 %v58_v6, %v58_v6  ;;  %v300_v7 = vld [vmem:[#allocation2 + $0xa8] sm:$0xff] }
  0xa9   :  { %v59_v10 = vsub.f32 %v45_v1, %v57_v8  ;;  %v62_v11 = vsel %vm48_vm0, %v60_v9, 0.0  ;;  %v294_v1 = vld [vmem:[#allocation2 + $0x78] sm:$0xff]  ;;  %v281_v9 = vld [vmem:[#allocation2 + $0x10] sm:$0xff] }
  0xaa   :  { %63 = vadd.xlane.f32.xlu1 %v62_v11  ;;  %v6136_v4 = vpack.c.bf16 %v294_v1, %v291_v0 }
  0xab   :  { %v61_v12 = vmul.f32 %v59_v10, %v59_v10 }
  0xad   :  { %v65_v13 = vsel %vm48_vm0, %v61_v12, 0.0  ;;  %v106_v12 = vlaneseq }
  0xae   :  { %66 = vadd.xlane.f32.xlu1 %v65_v13 }
  0xaf   :  { %v107_v13 = vshrl.u32 %v106_v12, 7  ;;  %v320_v57 = vand.u32 127, %v106_v12 }
  0xb1   :  { %v108_v14 = vsub.s32 0, %v107_v13  ;;  %v112_v16 = vsub.s32 1, %v107_v13  ;;  %v116_v18 = vsub.s32 2, %v107_v13  ;;  %v322_v3 = vadd.s32 256, %v320_v57 }
  0xb3   :  { %v109_v17 = vrot.slane %v104_v15, %v108_v14  ;;  %v113_v19 = vrot.slane %v104_v15, %v112_v16  ;;  %v117_v26 = vrot.slane %v104_v15, %v116_v18  ;;  %vm325_vm2 = vcmp.lt.s32.totalorder %v322_v3, 266 }
 0x137   :  { %v64_v36 = vpop.xlane.xlu1 %63 }
 0x138   :  { %v68_v37 = vmul.f32 0.03125, %v64_v36 }
 0x13a   :  { %v70_v38 = vadd.f32 1e-05, %v68_v37 }
 0x13b   :  { %v67_v39 = vpop.xlane.xlu1 %66 }
 0x13c   :  { %5882 = vrsqrt.f32 %v70_v38  ;;  %v69_v40 = vmul.f32 0.03125, %v67_v39 }
 0x13e   :  { %v71_v41 = vadd.f32 1e-05, %v69_v40 }
 0x140   :  { %5884 = vrsqrt.f32 %v71_v41  ;;  %v6185_v41 = vpack.c.bf16 %v296_v30, %v293_v29 }
 0x146   :  { %v5883_v42 = vpop.eup %5882 }
 0x147   :  { %v74_v44 = vmul.f32 %v5883_v42, %v58_v6  ;;  %v297_v6 = vld [vmem:[#allocation2 + $0x90] sm:$0xff]  ;;  %v299_v42 = vld [vmem:[#allocation2 + $0xa0] sm:$0xff] }
 0x148   :  { %v6146_v8 = vpack.c.bf16 %v300_v7, %v297_v6 }
 0x149   :  { %v82_v46 = vmul.f32 %v4219_v43, %v74_v44 }
 0x14a   :  { %v5885_v49 = vpop.eup %5884 }
 0x14b   :  { %v90_v52 = vadd.f32 %v4220_v45, %v82_v46  ;;  %v75_v53 = vmul.f32 %v5885_v49, %v59_v10  ;;  %v284_v10 = vld [vmem:[#allocation2 + $0x28] sm:$0xff] }
 0x14c   :  { %v6152_v11 = vpack.c.bf16 %v284_v10, %v281_v9  ;;  %v5996_v9 = vmov -1e+30  }
 0x14d   :  { %4221 = vmatmul.mubr.msk.f32.vlgmr.msra.gmra.mrb[0].mxu0 %vm48_vm0, %v90_v52  ;;  %4916 = vmatprep.mubr.msk.f32.mxu1 %vm48_vm0, %v90_v52  ;;  %v83_v55 = vmul.f32 %v4219_v43, %v75_v53  ;;  %v302_v43 = vld [vmem:[#allocation2 + $0xb8] sm:$0xff]  ;;  %v6235_v10 = vsel %vm325_vm2, 0.0, %v5996_v9 }
 0x14e   :  { %197 = vmatprep.mubr.f32.mxu0 %v7036_v21  ;;  %5520 = vmatpush1.bf16.msra.mxu0 %v6117_v54 }
 0x14f   :  { %v91_v61 = vadd.f32 %v4220_v45, %v83_v55  ;;  %5522 = vmatprep.subr.bf16.mxu0 %v6121_v56  ;;  %v6199_v45 = vpack.c.bf16 %v302_v43, %v299_v42 }
 0x151   :  { %4222 = vmatmul.mubr.msk.f32.gmra.mrb[2].mxu0 %vm48_vm0, %v91_v61  ;;  %4917 = vmatmul.mubr.msk.f32.vlgmr.msra.gmra.mrb[0].mxu1 %vm48_vm0, %v91_v61 }
 0x152   :  { %5488 = vmatpush1.bf16.msra.mxu1 %v6117_v54  ;;  %5524 = vmatpush1.bf16.msra.mxu0 %v6126_v62 }
 0x153   :  { %5490 = vmatprep.subr.bf16.mxu1 %v6121_v56  ;;  %5526 = vmatprep.subr.bf16.mxu0 %v6130_v63 }
 0x154   :  { %400 = vmatprep.mubr.f32.mxu1 %v7036_v21  ;;  %558 = vmatprep.mubr.f32.mxu0 %v7036_v21 }
 0x156   :  { %5492 = vmatpush1.bf16.msra.mxu1 %v6126_v62  ;;  %5528 = vmatpush1.bf16.msra.mxu0 %v6136_v4 }
 0x157   :  { %5494 = vmatprep.subr.bf16.mxu1 %v6130_v63  ;;  %5530 = vmatprep.subr.bf16.mxu0 %v6140_v5 }
 0x15a   :  { %5496 = vmatpush1.bf16.msra.mxu1 %v6136_v4  ;;  %5532 = vmatpush1.bf16.msra.mxu0 %v6146_v8 }
 0x15b   :  { %5498 = vmatprep.subr.bf16.mxu1 %v6140_v5 }
 0x15e   :  { %5500 = vmatpush1.bf16.msra.mxu1 %v6146_v8 }
 0x15f   :  { %5502 = vmatprep.subr.bf16.mxu1 %v6152_v11 }
 0x220   :  { %v193_v23 = vpop.f32.mrb[0].mxu0 }
 0x221   :  { %v6159_v24 = vadd.f32 %v193_v23, %v109_v17  ;;  %v195_v25 = vpop.f32.mrb[1].mxu0 }
 0x222   :  { %v6163_v28 = vadd.f32 %v195_v25, %v113_v19 }
 0x223   :  { %4225 = vmatmul.mubr.msk.f32.vlgmr.msra.gmra.mrb[2].mxu1 %vm329_vm1, %v6159_v24 }
 0x224   :  { %5504 = vmatpush3.bf16.msra.mxu1 %v6152_v11  ;;  %v199_v31 = vpop.f32.mrb[2].mxu0  ;;  %v4918_v32 = vpop.f32.mrb[0].mxu1  ;;  %4229 = vmatmul.mubr.msk.f32.vlgmr.msra.gmra.mrb[4].mxu0 %vm329_vm1, %v6163_v28  ;;  %v6172_v33 = vmul.f32 %v6163_v28, %v6163_v28 }
 0x225   :  { %v6174_v34 = vadd.f32 %v199_v31, %v109_v17  ;;  %v6176_v36 = vadd.f32 %v4918_v32, %v117_v26  ;;  %v201_v37 = vpop.f32.mrb[3].mxu0  ;;  %v270_v38 = vpop.f32.mrb[1].mxu1  ;;  %406 = vmatprep.mubr.f32.mxu1 %v7036_v21  ;;  %5506 = vmatprep.subr.bf16.mxu1 %v6161_v27 }
 0x226   :  { %v6180_v39 = vadd.f32 %v201_v37, %v113_v19  ;;  %v658_v40 = vsel %vm329_vm1, %v6172_v33, 0.0  ;;  %564 = vmatprep.mubr.f32.mxu0 %v7036_v21  ;;  %v6219_v47 = vadd.f32 %v270_v38, %v117_v26 }
 0x227   :  { %659 = vadd.xlane.f32.xlu0 %v658_v40  ;;  %4226 = vmatmul.mubr.msk.f32.gmra.mrb[4].mxu1 %vm329_vm1, %v6174_v34 }
 0x228   :  { %5508 = vmatpush3.bf16.msra.mxu1 %v6161_v27  ;;  %5031 = vmatprep.subr.mxu0 %v6176_v36  ;;  %v6193_v44 = vmul.f32 %v6180_v39, %v6180_v39 }
 0x229   :  { %4935 = vmatprep.mubr.msk.f32.mxu1 %vm329_vm1, %v6159_v24  ;;  %4230 = vmatmul.mubr.msk.f32.gmra.mrb[6].mxu0 %vm329_vm1, %v6180_v39 }
 0x22a   :  { %5032 = vmatpush3.msra.mxu0 %v6176_v36  ;;  %5510 = vmatprep.subr.bf16.mxu1 %v6185_v41  ;;  %v661_v46 = vsel %vm329_vm1, %v6193_v44, 0.0 }
 0x22b   :  { %662 = vadd.xlane.f32.xlu1 %v661_v46 }
 0x22c   :  { %5512 = vmatpush3.bf16.msra.mxu1 %v6185_v41 }
 0x22d   :  { %5514 = vmatprep.subr.bf16.mxu1 %v6199_v45 }
 0x230   :  { %5516 = vmatpush3.bf16.msra.mxu1 %v6199_v45 }
 0x231   :  { %5534 = vmatprep.subr.bf16.mxu1 %v6152_v11 }
 0x233   :  { %4936 = vmatmul.mubr.msk.f32.vlgmr.msra.gmra.mrb[6].mxu1 %vm329_vm1, %v6174_v34 }
 0x234   :  { %5536 = vmatpush3.bf16.msra.mxu1 %v6152_v11  ;;  %4954 = vmatprep.mubr.msk.f32.mxu1 %vm329_vm1, %v6163_v28 }
 0x235   :  { %5538 = vmatprep.subr.bf16.mxu1 %v6161_v27 }
 0x238   :  { %5540 = vmatpush3.bf16.msra.mxu1 %v6161_v27 }
 0x239   :  { %5542 = vmatprep.subr.bf16.mxu1 %v6185_v41 }
 0x23c   :  { %5544 = vmatpush3.bf16.msra.mxu1 %v6185_v41 }
 0x23d   :  { %5546 = vmatprep.subr.bf16.mxu1 %v6199_v45 }
 0x240   :  { %5548 = vmatpush3.bf16.msra.mxu1 %v6199_v45 }
 0x241   :  { %4957 = vmatprep.subr.mxu1 %v6219_v47 }
 0x243   :  { %4955 = vmatmul.mubr.msk.f32.vlgmr.msra.gmra.mrb[8].mxu1 %vm329_vm1, %v6180_v39 }
 0x244   :  { %4958 = vmatpush3.msra.mxu1 %v6219_v47 }
 0x2b4   :  { %v660_v48 = vpop.xlane.xlu0 %659 }
 0x2b5   :  { %v664_v49 = vmul.f32 0.0625, %v660_v48 }
 0x2b8   :  { %v663_v32 = vpop.xlane.xlu1 %662 }
 0x2b9   :  { %v665_v37 = vmul.f32 0.0625, %v663_v32 }
 0x2f6   :  { %v6226_v50 = vpop.f32.mrb[2].mxu1 }
 0x2f7   :  { %v6228_v51 = vpop.f32.mrb[3].mxu1  ;;  %v560_v52 = vpop.f32.mrb[4].mxu0 }
 0x2f8   :  { %v710_v53 = vsub.f32 %v560_v52, %v664_v49  ;;  %v562_v55 = vpop.f32.mrb[5].mxu0 }
 0x2f9   :  { %v711_v58 = vsub.f32 %v562_v55, %v664_v49 }
 0x2fa   :  { %v716_v59 = vadd.f32 0.0001, %v710_v53  ;;  %v6231_v60 = vpop.f32.mrb[4].mxu1 }
 0x2fb   :  { %v717_v61 = vadd.f32 0.0001, %v711_v58  ;;  %v6233_v0 = vpop.f32.mrb[5].mxu1 }
 0x2fc   :  { %v722_v1 = vmul.f32 1.442695, %v716_v59  ;;  %v566_v2 = vpop.f32.mrb[6].mxu0 }
 0x2fd   :  { %v724_v6 = vmul.f32 1.442695, %v717_v61  ;;  %v568_v7 = vpop.f32.mrb[7].mxu0  ;;  %v713_v38 = vsub.f32 %v566_v2, %v665_v37 }
 0x2fe   :  { %5886 = vpow2.f32 %v722_v1  ;;  %v714_v40 = vsub.f32 %v568_v7, %v665_v37 }
 0x2ff   :  { %5888 = vpow2.f32 %v724_v6  ;;  %v719_v42 = vadd.f32 0.0001, %v713_v38 }
 0x300   :  { %v720_v43 = vadd.f32 0.0001, %v714_v40 }
 0x301   :  { %v728_v46 = vmul.f32 1.442695, %v719_v42 }
 0x302   :  { %v730_v48 = vmul.f32 1.442695, %v720_v43 }
 0x303   :  { %5890 = vpow2.f32 %v728_v46 }
 0x304   :  { %5892 = vpow2.f32 %v730_v48 }
 0x306   :  { %v4937_v13 = vpop.f32.mrb[6].mxu1 }
 0x307   :  { %v6238_v12 = vadd.f32 %v4937_v13, %v6235_v10  ;;  %v479_v14 = vpop.f32.mrb[7].mxu1 }
 0x308   :  { %v5887_v15 = vpop.eup %5886  ;;  %v6241_v16 = vadd.f32 %v479_v14, %v6235_v10 }
 0x309   :  { %v5889_v17 = vpop.eup %5888  ;;  %v676_v18 = vmax.f32 %v6231_v60, %v6238_v12  ;;  %v6245_v19 = vmul.f32 0.061313935, %v5887_v15 }
 0x30a   :  { %v672_v20 = vmax.f32 %v6226_v50, %v6241_v16  ;;  %v6249_v22 = vmul.f32 0.061313935, %v5889_v17 }
 0x30b   :  { %794 = vxpose.xlu0.b32.start.end [1/1] (short) %v6245_v19, 128  ;;  %v6253_v23 = vmax.f32 %v676_v18, %v6233_v0 }
 0x30c   :  { %826 = vxpose.xlu1.b32.start.end [1/1] (short) %v6249_v22, 128  ;;  %v6257_v25 = vmax.f32 %v672_v20, %v6228_v51 }
 0x30d   :  { %v5891_v52 = vpop.eup %5890 }
 0x30e   :  { %v5893_v53 = vpop.eup %5892  ;;  %v6260_v55 = vmul.f32 0.061313935, %v5891_v52 }
 0x30f   :  { %v6262_v57 = vmul.f32 0.061313935, %v5893_v53 }
 0x316   :  { %v4956_v26 = vpop.f32.mrb[8].mxu1 }
 0x317   :  { %v637_v29 = vpop.f32.mrb[9].mxu1 }
 0x318   :  { %v638_v30 = vadd.f32 %v637_v29, %v6235_v10 }
 0x31a   :  { %v712_v31 = vsub.f32 %v638_v30, %v664_v49  ;;  %v643_v49 = vadd.f32 %v4956_v26, %v6235_v10 }
 0x31c   :  { %v715_v58 = vsub.f32 %v643_v49, %v665_v37  ;;  %v718_v59 = vadd.f32 0.0001, %v712_v31 }
 0x31e   :  { %v721_v61 = vadd.f32 0.0001, %v715_v58  ;;  %v726_v1 = vmul.f32 1.442695, %v718_v59 }
 0x320   :  { %v732_v2 = vmul.f32 1.442695, %v721_v61  ;;  %5894 = vpow2.f32 %v726_v1 }
 0x322   :  { %5896 = vpow2.f32 %v732_v2 }
 0x32a   :  { %v5895_v3 = vpop.eup %5894 }
 0x32b   :  { %v6267_v7 = vmul.f32 0.061313935, %v5895_v3 }
 0x32c   :  { %v5897_v6 = vpop.eup %5896 }
 0x32d   :  { %v6269_v9 = vmul.f32 0.061313935, %v5897_v6 }
 0x348   :  { %1340 = vxpose.xlu0.b32.start.end [1/1] (short) %v6260_v55, 128 }
 0x349   :  { %1372 = vxpose.xlu1.b32.start.end [1/1] (short) %v6262_v57, 128 }
 0x385   :  { %858 = vxpose.xlu0.b32.start.end [1/1] (short) %v6267_v7, 128 }
 0x386   :  { %1404 = vxpose.xlu1.b32.start.end [1/1] (short) %v6269_v9, 128 }
 0x38b   :  { %v810_v13 = vpop.trf.xlu0 }
 0x38c   :  { %4959 = vmatprep.mubr.msk.f32.mxu1 %vm890_vm3, %v810_v13  ;;  %v842_v14 = vpop.trf.xlu1 }
 0x38f   :  { %v811_v15 = vpop.trf.xlu0 }
 0x390   :  { %4960 = vmatmul.mubr.msk.f32.vlgmr.msra.gmra.mrb[10].mxu1 %vm890_vm3, %v811_v15  ;;  %v843_v17 = vpop.trf.xlu1 }
 0x393   :  { %v812_v18 = vpop.trf.xlu0 }
 0x394   :  { %4962 = vmatprep.mubr.msk.f32.mxu1 %vm890_vm3, %v812_v18  ;;  %v844_v20 = vpop.trf.xlu1 }
 0x397   :  { %v813_v26 = vpop.trf.xlu0 }
 0x398   :  { %4963 = vmatmul.mubr.msk.f32.gmra.mrb[12].mxu1 %vm890_vm3, %v813_v26  ;;  %v845_v29 = vpop.trf.xlu1 }
 0x39b   :  { %v814_v30 = vpop.trf.xlu0 }
 0x39c   :  { %4965 = vmatprep.mubr.msk.f32.mxu1 %vm890_vm3, %v814_v30  ;;  %v846_v31 = vpop.trf.xlu1 }
 0x39f   :  { %v815_v32 = vpop.trf.xlu0 }
 0x3a0   :  { %4966 = vmatmul.mubr.msk.f32.gmra.mrb[14].mxu1 %vm890_vm3, %v815_v32  ;;  %v847_v37 = vpop.trf.xlu1 }
 0x3a3   :  { %v816_v38 = vpop.trf.xlu0 }
 0x3a4   :  { %4968 = vmatprep.mubr.msk.f32.mxu1 %vm890_vm3, %v816_v38  ;;  %v848_v40 = vpop.trf.xlu1 }
 0x3a7   :  { %v817_v42 = vpop.trf.xlu0 }
 0x3a8   :  { %4969 = vmatmul.mubr.msk.f32.gmra.mrb[16].mxu1 %vm890_vm3, %v817_v42  ;;  %v849_v43 = vpop.trf.xlu1 }
 0x3ab   :  { %v818_v46 = vpop.trf.xlu0 }
 0x3ac   :  { %4971 = vmatprep.mubr.msk.f32.mxu1 %vm890_vm3, %v818_v46  ;;  %v850_v48 = vpop.trf.xlu1 }
 0x3af   :  { %v819_v52 = vpop.trf.xlu0 }
 0x3b0   :  { %4972 = vmatmul.mubr.msk.f32.gmra.mrb[18].mxu1 %vm890_vm3, %v819_v52  ;;  %v851_v53 = vpop.trf.xlu1 }
 0x3b3   :  { %v820_v49 = vpop.trf.xlu0 }
 0x3b4   :  { %4974 = vmatprep.mubr.msk.f32.mxu1 %vm890_vm3, %v820_v49  ;;  %v852_v58 = vpop.trf.xlu1  ;;  %v6326_v49 = vmul.f32 %v6159_v24, %v6159_v24 }
 0x3b7   :  { %v821_v59 = vpop.trf.xlu0 }
 0x3b8   :  { %4975 = vmatmul.mubr.msk.f32.gmra.mrb[20].mxu1 %vm890_vm3, %v821_v59  ;;  %v853_v61 = vpop.trf.xlu1 }
 0x3bb   :  { %v822_v1 = vpop.trf.xlu0 }
 0x3bc   :  { %4977 = vmatprep.mubr.msk.f32.mxu1 %vm890_vm3, %v822_v1  ;;  %v854_v2 = vpop.trf.xlu1  ;;  %v6334_v1 = vmul.f32 %v6174_v34, %v6174_v34 }
 0x3bf   :  { %v823_v3 = vpop.trf.xlu0 }
 0x3c0   :  { %4978 = vmatmul.mubr.msk.f32.gmra.mrb[22].mxu1 %vm890_vm3, %v823_v3  ;;  %v855_v6 = vpop.trf.xlu1  ;;  %v651_v3 = vsel %vm329_vm1, %v6334_v1, 0.0 }
 0x3c3   :  { %v824_v13 = vpop.trf.xlu0 }
 0x3c4   :  { %4980 = vmatprep.mubr.msk.f32.mxu1 %vm890_vm3, %v824_v13  ;;  %v856_v15 = vpop.trf.xlu1 }
 0x3c7   :  { %v825_v18 = vpop.trf.xlu0 }
 0x3c8   :  { %4981 = vmatmul.mubr.msk.f32.gmra.mrb[24].mxu1 %vm890_vm3, %v825_v18  ;;  %v857_v26 = vpop.trf.xlu1 }
 0x3c9   :  { %4983 = vmatprep.mubr.msk.f32.mxu1 %vm890_vm3, %v842_v14 }
 0x3cb   :  { %v1356_v30 = vpop.trf.xlu0 }
 0x3cc   :  { %4984 = vmatmul.mubr.msk.f32.gmra.mrb[26].mxu1 %vm890_vm3, %v843_v17  ;;  %5033 = vmatprep.mubr.msk.f32.mxu0 %vm890_vm3, %v1356_v30  ;;  %v6292_v32 = vpop.trf.xlu1 }
 0x3cd   :  { %4986 = vmatprep.mubr.msk.f32.mxu1 %vm890_vm3, %v844_v20 }
 0x3cf   :  { %v1357_v38 = vpop.trf.xlu0 }
 0x3d0   :  { %4987 = vmatmul.mubr.msk.f32.gmra.mrb[28].mxu1 %vm890_vm3, %v845_v29  ;;  %5034 = vmatmul.mubr.msk.f32.vlgmr.msra.gmra.mrb[8].mxu0 %vm890_vm3, %v1357_v38  ;;  %v6297_v42 = vpop.trf.xlu1 }
 0x3d1   :  { %4989 = vmatprep.mubr.msk.f32.mxu1 %vm890_vm3, %v846_v31 }
 0x3d3   :  { %v1358_v46 = vpop.trf.xlu0 }
 0x3d4   :  { %4990 = vmatmul.mubr.msk.f32.gmra.mrb[30].mxu1 %vm890_vm3, %v847_v37  ;;  %5036 = vmatprep.mubr.msk.f32.mxu0 %vm890_vm3, %v1358_v46  ;;  %v6302_v14 = vpop.trf.xlu1 }
 0x3d5   :  { %4992 = vmatprep.mubr.msk.f32.mxu1 %vm890_vm3, %v848_v40 }
 0x3d7   :  { %v1359_v17 = vpop.trf.xlu0 }
 0x3d8   :  { %4993 = vmatmul.mubr.msk.f32.gmra.mrb[32].mxu1 %vm890_vm3, %v849_v43  ;;  %5037 = vmatmul.mubr.msk.f32.gmra.mrb[10].mxu0 %vm890_vm3, %v1359_v17  ;;  %v6307_v20 = vpop.trf.xlu1 }
 0x3d9   :  { %4995 = vmatprep.mubr.msk.f32.mxu1 %vm890_vm3, %v850_v48 }
 0x3db   :  { %v1360_v29 = vpop.trf.xlu0 }
 0x3dc   :  { %4996 = vmatmul.mubr.msk.f32.gmra.mrb[34].mxu1 %vm890_vm3, %v851_v53  ;;  %5039 = vmatprep.mubr.msk.f32.mxu0 %vm890_vm3, %v1360_v29  ;;  %v6312_v31 = vpop.trf.xlu1 }
 0x3dd   :  { %4998 = vmatprep.mubr.msk.f32.mxu1 %vm890_vm3, %v852_v58 }
 0x3df   :  { %v1361_v37 = vpop.trf.xlu0 }
 0x3e0   :  { %4999 = vmatmul.mubr.msk.f32.gmra.mrb[36].mxu1 %vm890_vm3, %v853_v61  ;;  %5040 = vmatmul.mubr.msk.f32.gmra.mrb[12].mxu0 %vm890_vm3, %v1361_v37  ;;  %v1393_v40 = vpop.trf.xlu1  ;;  %v648_v61 = vsel %vm329_vm1, %v6326_v49, 0.0 }
 0x3e1   :  { %5001 = vmatprep.mubr.msk.f32.mxu1 %vm890_vm3, %v854_v2 }
 0x3e3   :  { %v1362_v43 = vpop.trf.xlu0 }
 0x3e4   :  { %5002 = vmatmul.mubr.msk.f32.gmra.mrb[38].mxu1 %vm890_vm3, %v855_v6  ;;  %5042 = vmatprep.mubr.msk.f32.mxu0 %vm890_vm3, %v1362_v43  ;;  %v1394_v48 = vpop.trf.xlu1 }
 0x3e5   :  { %5004 = vmatprep.mubr.msk.f32.mxu1 %vm890_vm3, %v856_v15 }
 0x3e7   :  { %v1363_v52 = vpop.trf.xlu0 }
 0x3e8   :  { %5005 = vmatmul.mubr.msk.f32.gmra.mrb[40].mxu1 %vm890_vm3, %v857_v26  ;;  %5043 = vmatmul.mubr.msk.f32.gmra.mrb[14].mxu0 %vm890_vm3, %v1363_v52  ;;  %v1395_v53 = vpop.trf.xlu1 }
 0x3e9   :  { %674 = vmax.xlane.f32.xlu1 %v6257_v25 }
 0x3eb   :  { %v1364_v58 = vpop.trf.xlu0 }
 0x3ec   :  { %5045 = vmatprep.mubr.msk.f32.mxu0 %vm890_vm3, %v1364_v58  ;;  %v1396_v59 = vpop.trf.xlu1 }
 0x3ed   :  { %678 = vmax.xlane.f32.xlu1 %v6253_v23 }
 0x3ee   :  { %649 = vadd.xlane.f32.xlu0 %v648_v61 }
 0x3ef   :  { %v1365_v2 = vpop.trf.xlu0 }
 0x3f0   :  { %5046 = vmatmul.mubr.msk.f32.gmra.mrb[16].mxu0 %vm890_vm3, %v1365_v2  ;;  %v1397_v25 = vpop.trf.xlu1 }
 0x3f2   :  { %652 = vadd.xlane.f32.xlu0 %v651_v3 }
 0x3f3   :  { %v1366_v6 = vpop.trf.xlu0 }
 0x3f4   :  { %5048 = vmatprep.mubr.msk.f32.mxu0 %vm890_vm3, %v1366_v6  ;;  %v1398_v23 = vpop.trf.xlu1 }
 0x3f7   :  { %v1367_v13 = vpop.trf.xlu0 }
 0x3f8   :  { %5049 = vmatmul.mubr.msk.f32.gmra.mrb[18].mxu0 %vm890_vm3, %v1367_v13  ;;  %v1399_v15 = vpop.trf.xlu1 }
 0x3fb   :  { %v1368_v18 = vpop.trf.xlu0 }
 0x3fc   :  { %5051 = vmatprep.mubr.msk.f32.mxu0 %vm890_vm3, %v1368_v18  ;;  %v1400_v26 = vpop.trf.xlu1 }
 0x3fe   :  { %2169 = vrot.lane.b32.xlu1 %v6174_v34, %s5997_s4 }
 0x3ff   :  { %v1369_v30 = vpop.trf.xlu0 }
 0x400   :  { %5052 = vmatmul.mubr.msk.f32.gmra.mrb[20].mxu0 %vm890_vm3, %v1369_v30  ;;  %v1401_v38 = vpop.trf.xlu1 }
 0x402   :  { %2327 = vrot.lane.b32.xlu1 %v6163_v28, %s5997_s4 }
 0x403   :  { %v1370_v46 = vpop.trf.xlu0 }
 0x404   :  { %5054 = vmatprep.mubr.msk.f32.mxu0 %vm890_vm3, %v1370_v46  ;;  %v1402_v17 = vpop.trf.xlu1 }
 0x406   :  { %2329 = vrot.lane.b32.xlu1 %v6180_v39, %s5997_s4 }
 0x407   :  { %v1371_v29 = vpop.trf.xlu0 }
 0x408   :  { %2167 = vrot.lane.b32.xlu0 %v6159_v24, %s5997_s4  ;;  %5055 = vmatmul.mubr.msk.f32.gmra.mrb[22].mxu0 %vm890_vm3, %v1371_v29  ;;  %v1403_v34 = vpop.trf.xlu1 }
 0x409   :  { %5057 = vmatprep.mubr.msk.f32.mxu0 %vm890_vm3, %v6292_v32 }
 0x40a   :  { %2507 = vrot.lane.b32.xlu1 %v6193_v44, %s5997_s4 }
 0x40b   :  { %v874_v28 = vpop.trf.xlu0 }
 0x40c   :  { %2505 = vrot.lane.b32.xlu0 %v6172_v33, %s5997_s4  ;;  %5058 = vmatmul.mubr.msk.f32.gmra.mrb[24].mxu0 %vm890_vm3, %v6297_v42  ;;  %v1420_v39 = vpop.trf.xlu1 }
 0x40d   :  { %5060 = vmatprep.mubr.msk.f32.mxu0 %vm890_vm3, %v6302_v14  ;;  %5007 = vmatprep.mubr.msk.f32.mxu1 %vm890_vm3, %v874_v28 }
 0x40f   :  { %v875_v24 = vpop.trf.xlu0 }
 0x410   :  { %5061 = vmatmul.mubr.msk.f32.gmra.mrb[26].mxu0 %vm890_vm3, %v6307_v20  ;;  %5008 = vmatmul.mubr.msk.f32.gmra.mrb[42].mxu1 %vm890_vm3, %v875_v24  ;;  %v1421_v44 = vpop.trf.xlu1 }
 0x411   :  { %5063 = vmatprep.mubr.msk.f32.mxu0 %vm890_vm3, %v6312_v31 }
 0x413   :  { %v876_v33 = vpop.trf.xlu0 }
 0x414   :  { %5064 = vmatmul.mubr.msk.f32.gmra.mrb[28].mxu0 %vm890_vm3, %v1393_v40  ;;  %5010 = vmatprep.mubr.msk.f32.mxu1 %vm890_vm3, %v876_v33  ;;  %v1422_v32 = vpop.trf.xlu1 }
 0x415   :  { %5066 = vmatprep.mubr.msk.f32.mxu0 %vm890_vm3, %v1394_v48 }
 0x417   :  { %v877_v42 = vpop.trf.xlu0 }
 0x418   :  { %5067 = vmatmul.mubr.msk.f32.gmra.mrb[30].mxu0 %vm890_vm3, %v1395_v53  ;;  %5011 = vmatmul.mubr.msk.f32.gmra.mrb[44].mxu1 %vm890_vm3, %v877_v42  ;;  %v1423_v14 = vpop.trf.xlu1 }
 0x419   :  { %5069 = vmatprep.mubr.msk.f32.mxu0 %vm890_vm3, %v1396_v59 }
 0x41b   :  { %v878_v20 = vpop.trf.xlu0 }
 0x41c   :  { %5070 = vmatmul.mubr.msk.f32.gmra.mrb[32].mxu0 %vm890_vm3, %v1397_v25  ;;  %5013 = vmatprep.mubr.msk.f32.mxu1 %vm890_vm3, %v878_v20  ;;  %v1424_v31 = vpop.trf.xlu1 }
 0x41d   :  { %5072 = vmatprep.mubr.msk.f32.mxu0 %vm890_vm3, %v1398_v23 }
 0x41f   :  { %v879_v37 = vpop.trf.xlu0 }
 0x420   :  { %5073 = vmatmul.mubr.msk.f32.gmra.mrb[34].mxu0 %vm890_vm3, %v1399_v15  ;;  %5014 = vmatmul.mubr.msk.f32.gmra.mrb[46].mxu1 %vm890_vm3, %v879_v37  ;;  %v1425_v40 = vpop.trf.xlu1 }
 0x421   :  { %5075 = vmatprep.mubr.msk.f32.mxu0 %vm890_vm3, %v1400_v26 }
 0x423   :  { %v880_v43 = vpop.trf.xlu0 }
 0x424   :  { %5076 = vmatmul.mubr.msk.f32.gmra.mrb[36].mxu0 %vm890_vm3, %v1401_v38  ;;  %5016 = vmatprep.mubr.msk.f32.mxu1 %vm890_vm3, %v880_v43  ;;  %v1426_v48 = vpop.trf.xlu1 }
 0x425   :  { %5078 = vmatprep.mubr.msk.f32.mxu0 %vm890_vm3, %v1402_v17 }
 0x427   :  { %v881_v52 = vpop.trf.xlu0 }
 0x428   :  { %5079 = vmatmul.mubr.msk.f32.gmra.mrb[38].mxu0 %vm890_vm3, %v1403_v34  ;;  %5017 = vmatmul.mubr.msk.f32.gmra.mrb[48].mxu1 %vm890_vm3, %v881_v52  ;;  %v1427_v53 = vpop.trf.xlu1 }
 0x429   :  { %5081 = vmatprep.mubr.msk.f32.mxu0 %vm890_vm3, %v1420_v39 }
 0x42b   :  { %v882_v58 = vpop.trf.xlu0 }
 0x42c   :  { %5019 = vmatprep.mubr.msk.f32.mxu1 %vm890_vm3, %v882_v58  ;;  %v1428_v59 = vpop.trf.xlu1  ;;  %5082 = vmatmul.mubr.msk.f32.gmra.mrb[40].mxu0 %vm890_vm3, %v1421_v44 }
 0x42d   :  { %5084 = vmatprep.mubr.msk.f32.mxu0 %vm890_vm3, %v1422_v32 }
 0x42f   :  { %v883_v61 = vpop.trf.xlu0 }
 0x430   :  { %5020 = vmatmul.mubr.msk.f32.gmra.mrb[50].mxu1 %vm890_vm3, %v883_v61  ;;  %v1429_v2 = vpop.trf.xlu1  ;;  %5085 = vmatmul.mubr.msk.f32.gmra.mrb[42].mxu0 %vm890_vm3, %v1423_v14 }
 0x431   :  { %5087 = vmatprep.mubr.msk.f32.mxu0 %vm890_vm3, %v1424_v31 }
 0x433   :  { %v884_v25 = vpop.trf.xlu0 }
 0x434   :  { %5022 = vmatprep.mubr.msk.f32.mxu1 %vm890_vm3, %v884_v25  ;;  %v1430_v3 = vpop.trf.xlu1  ;;  %5088 = vmatmul.mubr.msk.f32.gmra.mrb[44].mxu0 %vm890_vm3, %v1425_v40  ;;  %v758_v25 = vrot.slane %v6260_v55, 4 }
 0x435   :  { %5090 = vmatprep.mubr.msk.f32.mxu0 %vm890_vm3, %v1426_v48  ;;  %v740_v48 = vrot.slane %v6245_v19, 4 }
 0x437   :  { %v885_v6 = vpop.trf.xlu0 }
 0x438   :  { %5023 = vmatmul.mubr.msk.f32.gmra.mrb[52].mxu1 %vm890_vm3, %v885_v6  ;;  %v1431_v23 = vpop.trf.xlu1  ;;  %5091 = vmatmul.mubr.msk.f32.gmra.mrb[46].mxu0 %vm890_vm3, %v1427_v53  ;;  %v746_v53 = vrot.slane %v6249_v22, 4 }
 0x439   :  { %5093 = vmatprep.mubr.msk.f32.mxu0 %vm890_vm3, %v1428_v59 }
 0x43b   :  { %v886_v13 = vpop.trf.xlu0 }
 0x43c   :  { %5025 = vmatprep.mubr.msk.f32.mxu1 %vm890_vm3, %v886_v13  ;;  %v1432_v15 = vpop.trf.xlu1  ;;  %5094 = vmatmul.mubr.msk.f32.gmra.mrb[48].mxu0 %vm890_vm3, %v1429_v2 }
 0x43d   :  { %5096 = vmatprep.mubr.msk.f32.mxu0 %vm890_vm3, %v1430_v3 }
 0x43f   :  { %v887_v18 = vpop.trf.xlu0 }
 0x440   :  { %5026 = vmatmul.mubr.msk.f32.gmra.mrb[54].mxu1 %vm890_vm3, %v887_v18  ;;  %v1433_v26 = vpop.trf.xlu1  ;;  %5097 = vmatmul.mubr.msk.f32.gmra.mrb[50].mxu0 %vm890_vm3, %v1431_v23  ;;  %v7034_v18 = vmov 0.0|0.0  }
 0x441   :  { %5099 = vmatprep.mubr.msk.f32.mxu0 %vm890_vm3, %v1432_v15  ;;  %5581 = vmatprep.subr.bf16.mxu0 %v7034_v18 }
 0x443   :  { %v888_v30 = vpop.trf.xlu0 }
 0x444   :  { %5028 = vmatprep.mubr.msk.f32.mxu1 %vm890_vm3, %v888_v30  ;;  %v1434_v38 = vpop.trf.xlu1  ;;  %5100 = vmatmul.mubr.msk.f32.gmra.mrb[52].mxu0 %vm890_vm3, %v1433_v26  ;;  %v741_v26 = vadd.f32 %v740_v48, %v6245_v19  ;;  %v759_v19 = vadd.f32 %v758_v25, %v6260_v55 }
 0x445   :  { %5102 = vmatprep.mubr.msk.f32.mxu0 %vm890_vm3, %v1434_v38 }
 0x446   :  { %v760_v25 = vrot.slane %v759_v19, 2 }
 0x447   :  { %v889_v46 = vpop.trf.xlu0 }
 0x448   :  { %5029 = vmatmul.mubr.msk.f32.gmra.mrb[56].mxu1 %vm890_vm3, %v889_v46  ;;  %v1435_v17 = vpop.trf.xlu1  ;;  %v764_v46 = vrot.slane %v6262_v57, 4 }
 0x449   :  { %5103 = vmatmul.mubr.msk.f32.gmra.mrb[54].mxu0 %vm890_vm3, %v1435_v17 }
 0x44a   :  { %5137 = vmatprep.mubr.msk.f32.mxu0 %vm5999_vm4, %v7036_v21 }
 0x463   :  { %v6410_v29 = vpop.f32.mrb[10].mxu1 }
 0x464   :  { %v6412_v34 = vpop.f32.mrb[11].mxu1 }
 0x465   :  { %v5551_v28 = vpack.c.bf16 %v6410_v29, %v6412_v34 }
 0x46b   :  { %v6416_v39 = vpop.f32.mrb[12].mxu1 }
 0x46c   :  { %v6418_v24 = vpop.f32.mrb[13].mxu1 }
 0x46d   :  { %v5555_v44 = vpack.c.bf16 %v6416_v39, %v6418_v24 }
 0x473   :  { %v6422_v33 = vpop.f32.mrb[14].mxu1 }
 0x474   :  { %v6424_v32 = vpop.f32.mrb[15].mxu1 }
 0x475   :  { %v7037_v34 = vpack.c.bf16 %v6422_v33, %v6424_v32 }
 0x476   :  { %v675_v14 = vpop.xlane.xlu1 %674 }
 0x47a   :  { %v679_v20 = vpop.xlane.xlu1 %678 }
 0x47b   :  { %v6428_v31 = vpop.f32.mrb[16].mxu1  ;;  %v650_v37 = vpop.xlane.xlu0 %649 }
 0x47c   :  { %v654_v40 = vmul.f32 0.0625, %v650_v37  ;;  %v6430_v43 = vpop.f32.mrb[17].mxu1 }
 0x47d   :  { %v7038_v39 = vpack.c.bf16 %v6428_v31, %v6430_v43 }
 0x47e   :  { %v666_v58 = vsub.f32 %v6226_v50, %v654_v40  ;;  %v667_v59 = vsub.f32 %v6228_v51, %v654_v40  ;;  %v668_v61 = vsub.f32 %v6241_v16, %v654_v40  ;;  %v6439_v2 = vpop.permute.xlu1 %2169  ;;  %v747_v50 = vadd.f32 %v746_v53, %v6249_v22 }
 0x47f   :  { %v653_v3 = vpop.xlane.xlu0 %652  ;;  %v742_v53 = vrot.slane %v741_v26, 2 }
 0x480   :  { %v680_v6 = vsub.f32 %v666_v58, %v675_v14  ;;  %v681_v23 = vsub.f32 %v667_v59, %v675_v14  ;;  %v6442_v13 = vsub.f32 %v668_v61, %v675_v14  ;;  %v655_v15 = vmul.f32 0.0625, %v653_v3 }
 0x481   :  { %v765_v3 = vadd.f32 %v764_v46, %v6262_v57 }
 0x482   :  { %v686_v51 = vmul.f32 1.442695, %v680_v6  ;;  %v688_v30 = vmul.f32 1.442695, %v681_v23  ;;  %v669_v16 = vsub.f32 %v6231_v60, %v655_v15  ;;  %v6448_v38 = vpop.permute.xlu1 %2327  ;;  %v670_v17 = vsub.f32 %v6233_v0, %v655_v15 }
 0x483   :  { %v671_v14 = vsub.f32 %v6238_v12, %v655_v15  ;;  %v6453_v37 = vpop.f32.mrb[18].mxu1  ;;  %v6455_v40 = vpop.permute.xlu0 %2167  ;;  %v748_v0 = vrot.slane %v747_v50, 2  ;;  %v743_v15 = vadd.f32 %v742_v53, %v741_v26 }
 0x484   :  { %5898 = vpow2.f32 %v686_v51  ;;  %v683_v22 = vsub.f32 %v669_v16, %v679_v20  ;;  %v6458_v48 = vpop.f32.mrb[19].mxu1  ;;  %v684_v60 = vsub.f32 %v670_v17, %v679_v20  ;;  %v766_v16 = vrot.slane %v765_v3, 2 }
 0x485   :  { %v6460_v58 = vsub.f32 %v671_v14, %v679_v20  ;;  %5900 = vpow2.f32 %v688_v30  ;;  %v749_v51 = vadd.f32 %v748_v0, %v747_v50  ;;  %v744_v46 = vrot.slane %v743_v15, 1 }
 0x486   :  { %v692_v61 = vmul.f32 1.442695, %v683_v22  ;;  %v6464_v12 = vpop.permute.xlu1 %2329  ;;  %v694_v6 = vmul.f32 1.442695, %v684_v60  ;;  %v761_v22 = vadd.f32 %v760_v25, %v759_v19  ;;  %v767_v53 = vadd.f32 %v766_v16, %v765_v3 }
 0x487   :  { %v2506_v55 = vpop.permute.xlu0 %2505  ;;  %v7039_v33 = vpack.c.bf16 %v6453_v37, %v6458_v48 }
 0x488   :  { %5902 = vpow2.f32 %v692_v61  ;;  %v2511_v23 = vsel %vm329_vm1, %v2506_v55, 0.0  ;;  %v750_v61 = vrot.slane %v749_v51, 1  ;;  %v762_v50 = vrot.slane %v761_v22, 1 }
 0x489   :  { %2512 = vadd.xlane.f32.xlu0 %v2511_v23  ;;  %5904 = vpow2.f32 %v694_v6  ;;  %v745_v23 = vadd.f32 %v744_v46, %v743_v15 }
 0x48a   :  { %v2508_v20 = vpop.permute.xlu1 %2507 }
 0x48b   :  { %v6468_v17 = vpop.f32.mrb[20].mxu1  ;;  %v2514_v14 = vsel %vm329_vm1, %v2508_v20, 0.0  ;;  %v751_v20 = vadd.f32 %v750_v61, %v749_v51 }
 0x48c   :  { %2515 = vadd.xlane.f32.xlu1 %v2514_v14  ;;  %v6471_v30 = vpop.f32.mrb[21].mxu1  ;;  %v768_v14 = vrot.slane %v767_v53, 1 }
 0x48e   :  { %v5899_v60 = vpop.eup %5898  ;;  %v769_v46 = vadd.f32 %v768_v14, %v767_v53 }
 0x48f   :  { %v698_v26 = vadd.f32 0.0001, %v5899_v60  ;;  %v5901_v55 = vpop.eup %5900  ;;  %v763_v60 = vadd.f32 %v762_v50, %v761_v22 }
 0x490   :  { %v699_v6 = vadd.f32 0.0001, %v5901_v55 }
 0x491   :  { %v6475_v0 = vmul.f32 0.061313935, %v698_v26 }
 0x492   :  { %v5903_v18 = vpop.eup %5902  ;;  %v705_v25 = vmul.f32 0.061313935, %v699_v6 }
 0x493   :  { %v6477_v19 = vpop.f32.mrb[22].mxu1  ;;  %v701_v59 = vadd.f32 0.0001, %v5903_v18  ;;  %v776_v57 = vmul.f32 %v745_v23, %v6475_v0  ;;  %v5905_v52 = vpop.eup %5904 }
 0x494   :  { %v6480_v42 = vpop.f32.mrb[23].mxu1  ;;  %v777_v3 = vmul.f32 %v751_v20, %v705_v25  ;;  %1949 = vmatprep.mubr.f32.mxu1 %v705_v25  ;;  %v702_v26 = vadd.f32 0.0001, %v5905_v52 }
 0x495   :  { %v5575_v16 = vpack.c.bf16 %v6477_v19, %v6480_v42  ;;  %v6484_v15 = vmul.f32 0.061313935, %v701_v59 }
 0x496   :  { %v6486_v51 = vmul.f32 0.061313935, %v702_v26  ;;  %v6488_v61 = vadd.f32 %v777_v3, %v776_v57 }
 0x497   :  { %v779_v18 = vmul.f32 %v763_v60, %v6484_v15 }
 0x498   :  { %v780_v55 = vmul.f32 %v769_v46, %v6486_v51 }
 0x49a   :  { %v6492_v23 = vadd.f32 %v780_v55, %v779_v18 }
 0x49b   :  { %v4982_v6 = vpop.f32.mrb[24].mxu1 }
 0x49c   :  { %v1171_v22 = vpop.f32.mrb[25].mxu1 }
 0x49d   :  { %v5579_v50 = vpack.c.bf16 %v4982_v6, %v1171_v22 }
 0x49f   :  { %v4985_v20 = vpop.f32.mrb[26].mxu1  ;;  %2744 = vrot.lane.b32.xlu0 %v6219_v47, %s5997_s4 }
 0x4a0   :  { %v1181_v42 = vpop.f32.mrb[27].mxu1 }
 0x4a1   :  { %v5549_v52 = vpack.c.bf16 %v4985_v20, %v1181_v42 }
 0x4a3   :  { %v4988_v59 = vpop.f32.mrb[28].mxu1  ;;  %5550 = vmatprep.subr.bf16.mxu1 %v5549_v52  ;;  %3293 = vrot.lane.b32.xlu0 %v6176_v36, %s5997_s4  ;;  %v6500_v57 = vpop.f32.mrb[8].mxu0 }
 0x4a4   :  { %v1191_v53 = vpop.f32.mrb[29].mxu1  ;;  %5552 = vmatpush3.bf16.msra.mxu1 %v5551_v28  ;;  %v6505_v19 = vpop.f32.mrb[9].mxu0 }
 0x4a5   :  { %v5553_v47 = vpack.c.bf16 %v4988_v59, %v1191_v53  ;;  %v5607_v25 = vpack.c.bf16 %v6500_v57, %v6505_v19  ;;  %v7040_v53 = vpack.c.bf16 %v6468_v17, %v6471_v30 }
 0x4a7   :  { %v4991_v14 = vpop.f32.mrb[30].mxu1  ;;  %5554 = vmatprep.subr.bf16.mxu1 %v5553_v47 }
 0x4a8   :  { %v1201_v60 = vpop.f32.mrb[31].mxu1  ;;  %5556 = vmatpush3.bf16.msra.mxu1 %v5555_v44 }
 0x4a9   :  { %v5557_v36 = vpack.c.bf16 %v4991_v14, %v1201_v60 }
 0x4ab   :  { %v4994_v3 = vpop.f32.mrb[32].mxu1  ;;  %5558 = vmatprep.subr.bf16.mxu1 %v5557_v36  ;;  %v6512_v26 = vpop.f32.mrb[10].mxu0 }
 0x4ac   :  { %v1211_v29 = vpop.f32.mrb[33].mxu1  ;;  %5560 = vmatpush3.bf16.msra.mxu1 %v7037_v34  ;;  %v1656_v28 = vpop.f32.mrb[11].mxu0 }
 0x4ad   :  { %v5561_v46 = vpack.c.bf16 %v4994_v3, %v1211_v29  ;;  %v5611_v18 = vpack.c.bf16 %v6512_v26, %v1656_v28 }
 0x4af   :  { %v4997_v55 = vpop.f32.mrb[34].mxu1  ;;  %5562 = vmatprep.subr.bf16.mxu1 %v5561_v46 }
 0x4b0   :  { %v1221_v6 = vpop.f32.mrb[35].mxu1  ;;  %5564 = vmatpush3.bf16.msra.mxu1 %v7038_v39 }
 0x4b1   :  { %v5565_v24 = vpack.c.bf16 %v4997_v55, %v1221_v6 }
 0x4b3   :  { %v5000_v44 = vpop.f32.mrb[36].mxu1  ;;  %5566 = vmatprep.subr.bf16.mxu1 %v5565_v24  ;;  %v5041_v22 = vpop.f32.mrb[12].mxu0 }
 0x4b4   :  { %v1231_v20 = vpop.f32.mrb[37].mxu1  ;;  %5568 = vmatpush3.bf16.msra.mxu1 %v7039_v33  ;;  %v1666_v32 = vpop.f32.mrb[13].mxu0 }
 0x4b5   :  { %v5569_v42 = vpack.c.bf16 %v5000_v44, %v1231_v20  ;;  %v5615_v52 = vpack.c.bf16 %v5041_v22, %v1666_v32 }
 0x4b7   :  { %v5003_v59 = vpop.f32.mrb[38].mxu1  ;;  %5570 = vmatprep.subr.bf16.mxu1 %v5569_v42  ;;  %v7041_v42 = vmov 0.0|0.0  }
 0x4b8   :  { %v1241_v57 = vpop.f32.mrb[39].mxu1  ;;  %5572 = vmatpush3.bf16.msra.mxu1 %v7040_v53 }
 0x4b9   :  { %v5573_v31 = vpack.c.bf16 %v5003_v59, %v1241_v57 }
 0x4bb   :  { %v5006_v43 = vpop.f32.mrb[40].mxu1  ;;  %5574 = vmatprep.subr.bf16.mxu1 %v5573_v31  ;;  %v5044_v19 = vpop.f32.mrb[14].mxu0 }
 0x4bc   :  { %v1251_v47 = vpop.f32.mrb[41].mxu1  ;;  %5576 = vmatpush3.bf16.msra.mxu1 %v5575_v16  ;;  %v1676_v14 = vpop.f32.mrb[15].mxu0 }
 0x4bd   :  { %v5577_v60 = vpack.c.bf16 %v5006_v43, %v1251_v47  ;;  %v5619_v37 = vpack.c.bf16 %v5044_v19, %v1676_v14 }
 0x4bf   :  { %5578 = vmatprep.subr.bf16.mxu1 %v5577_v60 }
 0x4c0   :  { %5580 = vmatpush3.bf16.msra.mxu1 %v5579_v50 }
 0x4c3   :  { %1950 = vmatmul.mubr.f32.vlgmr.msra.gmra.mrb[58].mxu1 %v6475_v0  ;;  %v5047_v48 = vpop.f32.mrb[16].mxu0 }
 0x4c4   :  { %2089 = vmatprep.mubr.f32.mxu1 %v6486_v51  ;;  %v1686_v36 = vpop.f32.mrb[17].mxu0 }
 0x4c5   :  { %v5623_v3 = vpack.c.bf16 %v5047_v48, %v1686_v36 }
 0x4cb   :  { %v5050_v17 = vpop.f32.mrb[18].mxu0 }
 0x4cc   :  { %v1696_v30 = vpop.f32.mrb[19].mxu0 }
 0x4cd   :  { %v5627_v26 = vpack.c.bf16 %v5050_v17, %v1696_v30 }
 0x4d3   :  { %v5053_v29 = vpop.f32.mrb[20].mxu0 }
 0x4d4   :  { %v1706_v34 = vpop.f32.mrb[21].mxu0 }
 0x4d5   :  { %v5631_v28 = vpack.c.bf16 %v5053_v29, %v1706_v34 }
 0x4db   :  { %v5056_v46 = vpop.f32.mrb[22].mxu0 }
 0x4dc   :  { %v1716_v16 = vpop.f32.mrb[23].mxu0 }
 0x4dd   :  { %v5635_v55 = vpack.c.bf16 %v5056_v46, %v1716_v16 }
 0x4df   :  { %v5059_v6 = vpop.f32.mrb[24].mxu0 }
 0x4e0   :  { %v1726_v39 = vpop.f32.mrb[25].mxu0 }
 0x4e1   :  { %v5605_v24 = vpack.c.bf16 %v5059_v6, %v1726_v39 }
 0x4e3   :  { %v5062_v50 = vpop.f32.mrb[26].mxu0  ;;  %5606 = vmatprep.subr.bf16.mxu1 %v5605_v24  ;;  %v5009_v0 = vpop.f32.mrb[42].mxu1 }
 0x4e4   :  { %v1736_v44 = vpop.f32.mrb[27].mxu0  ;;  %5608 = vmatpush3.bf16.msra.mxu1 %v5607_v25  ;;  %v1261_v51 = vpop.f32.mrb[43].mxu1 }
 0x4e5   :  { %v5609_v22 = vpack.c.bf16 %v5062_v50, %v1736_v44  ;;  %v5582_v20 = vpack.c.bf16 %v5009_v0, %v1261_v51 }
 0x4e7   :  { %v5065_v33 = vpop.f32.mrb[28].mxu0  ;;  %5610 = vmatprep.subr.bf16.mxu1 %v5609_v22  ;;  %5583 = vmatpush3.bf16.msra.mxu0 %v5582_v20 }
 0x4e8   :  { %v1746_v32 = vpop.f32.mrb[29].mxu0  ;;  %5612 = vmatpush3.bf16.msra.mxu1 %v5611_v18  ;;  %5584 = vmatprep.subr.bf16.mxu0 %v7041_v42 }
 0x4e9   :  { %v5613_v59 = vpack.c.bf16 %v5065_v33, %v1746_v32 }
 0x4eb   :  { %v5068_v57 = vpop.f32.mrb[30].mxu0  ;;  %5614 = vmatprep.subr.bf16.mxu1 %v5613_v59  ;;  %v5012_v53 = vpop.f32.mrb[44].mxu1  ;;  %v690_v59 = vmul.f32 1.442695, %v6442_v13 }
 0x4ec   :  { %v1756_v31 = vpop.f32.mrb[31].mxu0  ;;  %5616 = vmatpush3.bf16.msra.mxu1 %v5615_v52  ;;  %v1271_v43 = vpop.f32.mrb[45].mxu1 }
 0x4ed   :  { %v5617_v19 = vpack.c.bf16 %v5068_v57, %v1756_v31  ;;  %v5585_v47 = vpack.c.bf16 %v5012_v53, %v1271_v43  ;;  %5906 = vpow2.f32 %v690_v59 }
 0x4ef   :  { %v5071_v25 = vpop.f32.mrb[32].mxu0  ;;  %5618 = vmatprep.subr.bf16.mxu1 %v5617_v19  ;;  %5586 = vmatpush3.bf16.msra.mxu0 %v5585_v47 }
 0x4f0   :  { %v1766_v14 = vpop.f32.mrb[33].mxu0  ;;  %5620 = vmatpush3.bf16.msra.mxu1 %v5619_v37  ;;  %5587 = vmatprep.subr.bf16.mxu0 %v7041_v42 }
 0x4f1   :  { %v5621_v60 = vpack.c.bf16 %v5071_v25, %v1766_v14 }
 0x4f3   :  { %v5074_v18 = vpop.f32.mrb[34].mxu0  ;;  %5622 = vmatprep.subr.bf16.mxu1 %v5621_v60  ;;  %v5015_v48 = vpop.f32.mrb[46].mxu1 }
 0x4f4   :  { %v1776_v36 = vpop.f32.mrb[35].mxu0  ;;  %5624 = vmatpush3.bf16.msra.mxu1 %v5623_v3  ;;  %v1281_v17 = vpop.f32.mrb[47].mxu1 }
 0x4f5   :  { %v5625_v30 = vpack.c.bf16 %v5074_v18, %v1776_v36  ;;  %v5588_v29 = vpack.c.bf16 %v5015_v48, %v1281_v17 }
 0x4f7   :  { %v5077_v52 = vpop.f32.mrb[36].mxu0  ;;  %5626 = vmatprep.subr.bf16.mxu1 %v5625_v30  ;;  %5589 = vmatpush3.bf16.msra.mxu0 %v5588_v29 }
 0x4f8   :  { %v1786_v34 = vpop.f32.mrb[37].mxu0  ;;  %5628 = vmatpush3.bf16.msra.mxu1 %v5627_v26  ;;  %5590 = vmatprep.subr.bf16.mxu0 %v7041_v42 }
 0x4f9   :  { %v5629_v46 = vpack.c.bf16 %v5077_v52, %v1786_v34  ;;  %v5907_v52 = vpop.eup %5906 }
 0x4fb   :  { %v5080_v37 = vpop.f32.mrb[38].mxu0  ;;  %5630 = vmatprep.subr.bf16.mxu1 %v5629_v46  ;;  %v5018_v16 = vpop.f32.mrb[48].mxu1 }
 0x4fc   :  { %v1796_v6 = vpop.f32.mrb[39].mxu0  ;;  %5632 = vmatpush3.bf16.msra.mxu1 %v5631_v28  ;;  %v1291_v39 = vpop.f32.mrb[49].mxu1 }
 0x4fd   :  { %v5633_v24 = vpack.c.bf16 %v5080_v37, %v1796_v6  ;;  %v5591_v50 = vpack.c.bf16 %v5018_v16, %v1291_v39  ;;  %v700_v37 = vadd.f32 0.0001, %v5907_v52 }
 0x4ff   :  { %5634 = vmatprep.subr.bf16.mxu1 %v5633_v24  ;;  %5592 = vmatpush3.bf16.msra.mxu0 %v5591_v50  ;;  %v6532_v3 = vpop.f32.mrb[40].mxu0  ;;  %v6588_v50 = vmul.f32 0.061313935, %v700_v37 }
 0x500   :  { %5636 = vmatpush3.bf16.msra.mxu1 %v5635_v55  ;;  %5593 = vmatprep.subr.bf16.mxu0 %v7041_v42  ;;  %v6535_v0 = vpop.f32.mrb[41].mxu0 }
 0x501   :  { %5662 = vmatprep.subr.bf16.mxu1 %v6107_v35  ;;  %v5638_v26 = vpack.c.bf16 %v6532_v3, %v6535_v0 }
 0x503   :  { %2090 = vmatmul.mubr.f32.vlgmr.msra.gmra.mrb[60].mxu1 %v6484_v15  ;;  %v5021_v28 = vpop.f32.mrb[50].mxu1  ;;  %v6541_v44 = vpop.f32.mrb[42].mxu0 }
 0x504   :  { %5664 = vmatpush1.bf16.msra.mxu1 %v6117_v54  ;;  %v1301_v51 = vpop.f32.mrb[51].mxu1  ;;  %2239 = vmatprep.mubr.f32.mxu1 %v7036_v21  ;;  %v6545_v55 = vpop.f32.mrb[43].mxu0 }
 0x505   :  { %5666 = vmatprep.subr.bf16.mxu1 %v6121_v56  ;;  %v5594_v22 = vpack.c.bf16 %v5021_v28, %v1301_v51  ;;  %v5641_v20 = vpack.c.bf16 %v6541_v44, %v6545_v55 }
 0x507   :  { %5595 = vmatpush3.bf16.msra.mxu0 %v5594_v22  ;;  %v6550_v33 = vpop.f32.mrb[44].mxu0 }
 0x508   :  { %5668 = vmatpush1.bf16.msra.mxu1 %v6126_v62  ;;  %5596 = vmatprep.subr.bf16.mxu0 %v7041_v42  ;;  %v6554_v15 = vpop.f32.mrb[45].mxu0 }
 0x509   :  { %5670 = vmatprep.subr.bf16.mxu1 %v6130_v63  ;;  %v5644_v32 = vpack.c.bf16 %v6550_v33, %v6554_v15 }
 0x50b   :  { %v5024_v57 = vpop.f32.mrb[52].mxu1  ;;  %v6560_v53 = vpop.f32.mrb[46].mxu0 }
 0x50c   :  { %5672 = vmatpush1.bf16.msra.mxu1 %v6136_v4  ;;  %v1311_v31 = vpop.f32.mrb[53].mxu1  ;;  %v6563_v43 = vpop.f32.mrb[47].mxu0 }
 0x50d   :  { %5674 = vmatprep.subr.bf16.mxu1 %v6140_v5  ;;  %v5597_v19 = vpack.c.bf16 %v5024_v57, %v1311_v31  ;;  %v5647_v47 = vpack.c.bf16 %v6560_v53, %v6563_v43 }
 0x50f   :  { %5598 = vmatpush3.bf16.msra.mxu0 %v5597_v19  ;;  %v5095_v25 = vpop.f32.mrb[48].mxu0 }
 0x510   :  { %5676 = vmatpush1.bf16.msra.mxu1 %v6146_v8  ;;  %5599 = vmatprep.subr.bf16.mxu0 %v7041_v42  ;;  %v1846_v13 = vpop.f32.mrb[49].mxu0 }
 0x511   :  { %5694 = vmatprep.subr.bf16.mxu1 %v6107_v35  ;;  %v5650_v14 = vpack.c.bf16 %v5095_v25, %v1846_v13 }
 0x513   :  { %4329 = vmatmul.mubr.msk.f32.vlgmr.msra.gmra.mrb[62].mxu1 %vm329_vm1, %v6455_v40  ;;  %v5027_v60 = vpop.f32.mrb[54].mxu1  ;;  %v5098_v18 = vpop.f32.mrb[50].mxu0 }
 0x514   :  { %5696 = vmatpush1.bf16.msra.mxu1 %v6117_v54  ;;  %2245 = vmatprep.mubr.f32.mxu1 %v7036_v21  ;;  %v1321_v48 = vpop.f32.mrb[55].mxu1  ;;  %v1856_v36 = vpop.f32.mrb[51].mxu0 }
 0x515   :  { %5698 = vmatprep.subr.bf16.mxu1 %v6121_v56  ;;  %v5600_v17 = vpack.c.bf16 %v5027_v60, %v1321_v48  ;;  %v5653_v30 = vpack.c.bf16 %v5098_v18, %v1856_v36 }
 0x516   :  { %v6576_v29 = vpop.xlane.xlu0 %2512 }
 0x517   :  { %4330 = vmatmul.mubr.msk.f32.gmra.mrb[64].mxu1 %vm329_vm1, %v6439_v2  ;;  %5601 = vmatpush3.bf16.msra.mxu0 %v5600_v17  ;;  %v5101_v35 = vpop.f32.mrb[52].mxu0  ;;  %v2517_v28 = vmul.f32 0.0625, %v6576_v29 }
 0x518   :  { %5700 = vmatpush1.bf16.msra.mxu1 %v6126_v62  ;;  %5602 = vmatprep.subr.bf16.mxu0 %v7041_v42  ;;  %v1866_v54 = vpop.f32.mrb[53].mxu0 }
 0x519   :  { %5702 = vmatprep.subr.bf16.mxu1 %v6130_v63  ;;  %2399 = vmatprep.mubr.f32.mxu1 %v7036_v21  ;;  %v5656_v56 = vpack.c.bf16 %v5101_v35, %v1866_v54 }
 0x51a   :  { %v6584_v34 = vpop.permute.xlu0 %2744 }
 0x51b   :  { %v5030_v46 = vpop.f32.mrb[56].mxu1 }
 0x51c   :  { %v1331_v16 = vpop.f32.mrb[57].mxu1  ;;  %5704 = vmatpush1.bf16.msra.mxu1 %v6136_v4  ;;  %v5104_v6 = vpop.f32.mrb[54].mxu0  ;;  %v696_v4 = vmul.f32 1.442695, %v6460_v58 }
 0x51d   :  { %v5603_v39 = vpack.c.bf16 %v5030_v46, %v1331_v16  ;;  %5706 = vmatprep.subr.bf16.mxu1 %v6140_v5  ;;  %v1876_v62 = vpop.f32.mrb[55].mxu0 }
 0x51e   :  { %v5659_v24 = vpack.c.bf16 %v5104_v6, %v1876_v62  ;;  %v3294_v63 = vpop.permute.xlu0 %3293  ;;  %5908 = vpow2.f32 %v696_v4 }
 0x51f   :  { %5604 = vmatpush3.bf16.msra.mxu0 %v5603_v39 }
 0x520   :  { %5708 = vmatpush1.bf16.msra.mxu1 %v6146_v8  ;;  %5637 = vmatprep.subr.bf16.mxu0 %v7041_v42 }
 0x521   :  { %5287 = vmatprep.subr.mxu1 %v3294_v63 }
 0x522   :  { %5138 = vmatmul.mubr.f32.vlgmr.msra.gmra.mrb[56].mxu0 %v6588_v50 }
 0x523   :  { %5639 = vmatpush3.bf16.msra.mxu0 %v5638_v26  ;;  %4333 = vmatmul.mubr.msk.f32.vlgmr.msra.gmra.mrb[66].mxu1 %vm329_vm1, %v6448_v38 }
 0x524   :  { %5288 = vmatpush3.msra.mxu1 %v3294_v63  ;;  %5640 = vmatprep.subr.bf16.mxu0 %v7041_v42 }
 0x525   :  { %2405 = vmatprep.mubr.f32.mxu1 %v7036_v21  ;;  %5172 = vmatprep.mubr.msk.f32.mxu0 %vm5999_vm4, %v7036_v21 }
 0x526   :  { %5757 = vmatprep.subr.bf16.mxu1 %v7041_v42 }
 0x527   :  { %5642 = vmatpush3.bf16.msra.mxu0 %v5641_v20  ;;  %4334 = vmatmul.mubr.msk.f32.gmra.mrb[68].mxu1 %vm329_vm1, %v6464_v12 }
 0x528   :  { %5643 = vmatprep.subr.bf16.mxu0 %v7041_v42  ;;  %v5909_v5 = vpop.eup %5908 }
 0x529   :  { %v703_v8 = vadd.f32 0.0001, %v5909_v5 }
 0x52b   :  { %5645 = vmatpush3.bf16.msra.mxu0 %v5644_v32  ;;  %v6618_v58 = vmul.f32 0.061313935, %v703_v8 }
 0x52c   :  { %5646 = vmatprep.subr.bf16.mxu0 %v7041_v42 }
 0x52f   :  { %5648 = vmatpush3.bf16.msra.mxu0 %v5647_v47 }
 0x530   :  { %5649 = vmatprep.subr.bf16.mxu0 %v7041_v42 }
 0x533   :  { %5651 = vmatpush3.bf16.msra.mxu0 %v5650_v14 }
 0x534   :  { %5652 = vmatprep.subr.bf16.mxu0 %v7041_v42 }
 0x537   :  { %5654 = vmatpush3.bf16.msra.mxu0 %v5653_v30  ;;  %v2516_v30 = vpop.xlane.xlu1 %2515 }
 0x538   :  { %5655 = vmatprep.subr.bf16.mxu0 %v7041_v42  ;;  %v2518_v52 = vmul.f32 0.0625, %v2516_v30 }
 0x53b   :  { %5657 = vmatpush3.bf16.msra.mxu0 %v5656_v56 }
 0x53c   :  { %5658 = vmatprep.subr.bf16.mxu0 %v7041_v42 }
 0x53f   :  { %5660 = vmatpush3.bf16.msra.mxu0 %v5659_v24 }
 0x540   :  { %5678 = vmatprep.subr.bf16.mxu0 %v6152_v11 }
 0x542   :  { %5173 = vmatmul.mubr.f32.vlgmr.msra.gmra.mrb[58].mxu0 %v6618_v58 }
 0x543   :  { %5680 = vmatpush3.bf16.msra.mxu0 %v6152_v11  ;;  %5191 = vmatprep.mubr.msk.f32.mxu0 %vm329_vm1, %v6455_v40 }
 0x544   :  { %5682 = vmatprep.subr.bf16.mxu0 %v6161_v27 }
 0x547   :  { %5684 = vmatpush3.bf16.msra.mxu0 %v6161_v27 }
 0x548   :  { %5686 = vmatprep.subr.bf16.mxu0 %v6185_v41 }
 0x54b   :  { %5688 = vmatpush3.bf16.msra.mxu0 %v6185_v41 }
 0x54c   :  { %5690 = vmatprep.subr.bf16.mxu0 %v6199_v45 }
 0x54f   :  { %5692 = vmatpush3.bf16.msra.mxu0 %v6199_v45 }
 0x550   :  { %5710 = vmatprep.subr.bf16.mxu0 %v6152_v11 }
 0x552   :  { %5192 = vmatmul.mubr.msk.f32.vlgmr.msra.gmra.mrb[60].mxu0 %vm329_vm1, %v6439_v2 }
 0x553   :  { %5712 = vmatpush3.bf16.msra.mxu0 %v6152_v11  ;;  %5210 = vmatprep.mubr.msk.f32.mxu0 %vm329_vm1, %v6448_v38 }
 0x554   :  { %5714 = vmatprep.subr.bf16.mxu0 %v6161_v27 }
 0x557   :  { %5716 = vmatpush3.bf16.msra.mxu0 %v6161_v27 }
 0x558   :  { %5718 = vmatprep.subr.bf16.mxu0 %v6185_v41 }
 0x55b   :  { %5720 = vmatpush3.bf16.msra.mxu0 %v6185_v41 }
 0x55c   :  { %5722 = vmatprep.subr.bf16.mxu0 %v6199_v45 }
 0x55f   :  { %5724 = vmatpush3.bf16.msra.mxu0 %v6199_v45 }
 0x560   :  { %5213 = vmatprep.subr.mxu0 %v6584_v34 }
 0x562   :  { %5211 = vmatmul.mubr.msk.f32.vlgmr.msra.gmra.mrb[62].mxu0 %vm329_vm1, %v6464_v12 }
 0x563   :  { %5214 = vmatpush3.msra.mxu0 %v6584_v34 }
 0x596   :  { %v4594_v11 = vpop.f32.mrb[58].mxu1 }
 0x597   :  { %v4595_v2 = vpop.f32.mrb[59].mxu1 }
 0x598   :  { %v4596_v38 = vadd.f32 %v4595_v2, %v4594_v11 }
 0x5d6   :  { %v4646_v40 = vpop.f32.mrb[60].mxu1 }
 0x5d7   :  { %v4647_v27 = vpop.f32.mrb[61].mxu1 }
 0x5d8   :  { %v4648_v3 = vadd.f32 %v4647_v27, %v4646_v40 }
 0x5e6   :  { %v6647_v0 = vpop.f32.mrb[62].mxu1 }
 0x5e7   :  { %v6649_v41 = vpop.f32.mrb[63].mxu1 }
 0x5ea   :  { %v6651_v26 = vpop.f32.mrb[64].mxu1 }
 0x5eb   :  { %v6653_v45 = vpop.f32.mrb[65].mxu1 }
 0x5f5   :  { %v2021_v44 = vpop.f32.mrb[56].mxu0 }
 0x5f6   :  { %v6656_v12 = vadd.f32 %v4596_v38, %v2021_v44  ;;  %v5139_v51 = vpop.f32.mrb[57].mxu0  ;;  %v2401_v55 = vpop.f32.mrb[66].mxu1 }
 0x5f7   :  { %v2563_v22 = vsub.f32 %v2401_v55, %v2517_v28  ;;  %v2403_v20 = vpop.f32.mrb[67].mxu1 }
 0x5f8   :  { %7042 = vst [vmem:[#allocation8_spill] sm:$0xff] %v6656_v12  ;;  %v2564_v33 = vsub.f32 %v2403_v20, %v2517_v28 }
 0x5f9   :  { %v2569_v15 = vadd.f32 0.0001, %v2563_v22 }
 0x5fa   :  { %v2570_v32 = vadd.f32 0.0001, %v2564_v33  ;;  %v2407_v59 = vpop.f32.mrb[68].mxu1 }
 0x5fb   :  { %v2575_v57 = vmul.f32 1.442695, %v2569_v15  ;;  %v2409_v53 = vpop.f32.mrb[69].mxu1  ;;  %v2566_v34 = vsub.f32 %v2407_v59, %v2518_v52 }
 0x5fc   :  { %v2577_v31 = vmul.f32 1.442695, %v2570_v32  ;;  %v2567_v40 = vsub.f32 %v2409_v53, %v2518_v52 }
 0x5fd   :  { %5910 = vpow2.f32 %v2575_v57  ;;  %v2572_v46 = vadd.f32 0.0001, %v2566_v34 }
 0x5fe   :  { %5912 = vpow2.f32 %v2577_v31  ;;  %v2573_v27 = vadd.f32 0.0001, %v2567_v40 }
 0x5ff   :  { %v2581_v37 = vmul.f32 1.442695, %v2572_v46 }
 0x601   :  { %5914 = vpow2.f32 %v2581_v37 }
 0x607   :  { %v5911_v43 = vpop.eup %5910 }
 0x608   :  { %v5913_v19 = vpop.eup %5912  ;;  %v6658_v47 = vmul.f32 0.061313935, %v5911_v43 }
 0x609   :  { %v6660_v25 = vmul.f32 0.061313935, %v5913_v19 }
 0x60a   :  { %2647 = vxpose.xlu1.b32.start.end [1/1] (short) %v6658_v47, 128 }
 0x60b   :  { %2679 = vxpose.xlu0.b32.start.end [1/1] (short) %v6660_v25, 128  ;;  %v5915_v8 = vpop.eup %5914 }
 0x60c   :  { %v6684_v11 = vmul.f32 0.061313935, %v5915_v8 }
 0x615   :  { %v2161_v13 = vpop.f32.mrb[58].mxu0 }
 0x616   :  { %v6664_v14 = vadd.f32 %v4648_v3, %v2161_v13  ;;  %v5174_v60 = vpop.f32.mrb[59].mxu0  ;;  %v2583_v3 = vmul.f32 1.442695, %v2573_v27 }
 0x618   :  { %7043 = vst [vmem:[#allocation9_spill] sm:$0xff] %v6664_v14 }
 0x625   :  { %v5193_v18 = vpop.f32.mrb[60].mxu0 }
 0x626   :  { %v6667_v48 = vadd.f32 %v5193_v18, %v6235_v10  ;;  %v2318_v36 = vpop.f32.mrb[61].mxu0 }
 0x627   :  { %v6670_v17 = vadd.f32 %v2318_v36, %v6235_v10 }
 0x628   :  { %v2529_v29 = vmax.f32 %v6651_v26, %v6667_v48 }
 0x629   :  { %v2525_v35 = vmax.f32 %v6647_v0, %v6670_v17 }
 0x62a   :  { %v6677_v54 = vmax.f32 %v2529_v29, %v6653_v45 }
 0x62b   :  { %v6680_v56 = vmax.f32 %v2525_v35, %v6649_v41 }
 0x635   :  { %v5212_v16 = vpop.f32.mrb[62].mxu0 }
 0x636   :  { %v2484_v6 = vadd.f32 %v5212_v16, %v6235_v10  ;;  %v2478_v39 = vpop.f32.mrb[63].mxu0 }
 0x637   :  { %v2479_v62 = vadd.f32 %v2478_v39, %v6235_v10 }
 0x638   :  { %v2568_v24 = vsub.f32 %v2484_v6, %v2518_v52 }
 0x639   :  { %v2565_v63 = vsub.f32 %v2479_v62, %v2517_v28 }
 0x63a   :  { %v2574_v10 = vadd.f32 0.0001, %v2568_v24 }
 0x63b   :  { %v2571_v4 = vadd.f32 0.0001, %v2565_v63 }
 0x63c   :  { %v2585_v44 = vmul.f32 1.442695, %v2574_v10 }
 0x63d   :  { %v2579_v5 = vmul.f32 1.442695, %v2571_v4 }
 0x63f   :  { %5916 = vpow2.f32 %v2579_v5 }
 0x640   :  { %5918 = vpow2.f32 %v2583_v3 }
 0x641   :  { %5920 = vpow2.f32 %v2585_v44 }
 0x648   :  { %3196 = vxpose.xlu0.b32.start.end [1/1] (short) %v6684_v11, 128 }
 0x649   :  { %v5917_v2 = vpop.eup %5916 }
 0x64a   :  { %v6687_v38 = vmul.f32 0.061313935, %v5917_v2  ;;  %v5919_v28 = vpop.eup %5918 }
 0x64b   :  { %v6690_v51 = vmul.f32 0.061313935, %v5919_v28  ;;  %v5921_v55 = vpop.eup %5920 }
 0x64c   :  { %2711 = vxpose.xlu1.b32.start.end [1/1] (short) %v6687_v38, 128  ;;  %v6693_v22 = vmul.f32 0.061313935, %v5921_v55 }
 0x685   :  { %3228 = vxpose.xlu0.b32.start.end [1/1] (short) %v6690_v51, 128 }
 0x689   :  { %3260 = vxpose.xlu1.b32.start.end [1/1] (short) %v6693_v22, 128 }
 0x68a   :  { %v2663_v20 = vpop.trf.xlu1 }
 0x68b   :  { %v2695_v33 = vpop.trf.xlu0  ;;  %5215 = vmatprep.mubr.msk.f32.mxu0 %vm890_vm3, %v2663_v20 }
 0x68e   :  { %v2664_v15 = vpop.trf.xlu1 }
 0x68f   :  { %v2696_v32 = vpop.trf.xlu0  ;;  %5216 = vmatmul.mubr.msk.f32.vlgmr.msra.gmra.mrb[64].mxu0 %vm890_vm3, %v2664_v15 }
 0x692   :  { %v2665_v59 = vpop.trf.xlu1 }
 0x693   :  { %v2697_v57 = vpop.trf.xlu0  ;;  %5218 = vmatprep.mubr.msk.f32.mxu0 %vm890_vm3, %v2665_v59 }
 0x696   :  { %v2666_v53 = vpop.trf.xlu1 }
 0x697   :  { %v2698_v31 = vpop.trf.xlu0  ;;  %5219 = vmatmul.mubr.msk.f32.gmra.mrb[66].mxu0 %vm890_vm3, %v2666_v53 }
 0x69a   :  { %v2667_v43 = vpop.trf.xlu1 }
 0x69b   :  { %v2699_v19 = vpop.trf.xlu0  ;;  %5221 = vmatprep.mubr.msk.f32.mxu0 %vm890_vm3, %v2667_v43 }
 0x69e   :  { %v2668_v13 = vpop.trf.xlu1 }
 0x69f   :  { %v2700_v60 = vpop.trf.xlu0  ;;  %5222 = vmatmul.mubr.msk.f32.gmra.mrb[68].mxu0 %vm890_vm3, %v2668_v13 }
 0x6a2   :  { %v2669_v18 = vpop.trf.xlu1 }
 0x6a3   :  { %v2701_v36 = vpop.trf.xlu0  ;;  %5224 = vmatprep.mubr.msk.f32.mxu0 %vm890_vm3, %v2669_v18 }
 0x6a6   :  { %v2670_v30 = vpop.trf.xlu1 }
 0x6a7   :  { %v2702_v29 = vpop.trf.xlu0  ;;  %5225 = vmatmul.mubr.msk.f32.gmra.mrb[70].mxu0 %vm890_vm3, %v2670_v30 }
 0x6aa   :  { %v2671_v35 = vpop.trf.xlu1 }
 0x6ab   :  { %v2703_v52 = vpop.trf.xlu0  ;;  %5227 = vmatprep.mubr.msk.f32.mxu0 %vm890_vm3, %v2671_v35 }
 0x6ae   :  { %v2672_v34 = vpop.trf.xlu1 }
 0x6af   :  { %v2704_v46 = vpop.trf.xlu0  ;;  %5228 = vmatmul.mubr.msk.f32.gmra.mrb[72].mxu0 %vm890_vm3, %v2672_v34 }
 0x6b2   :  { %v2673_v37 = vpop.trf.xlu1 }
 0x6b3   :  { %v2705_v16 = vpop.trf.xlu0  ;;  %5230 = vmatprep.mubr.msk.f32.mxu0 %vm890_vm3, %v2673_v37 }
 0x6b6   :  { %v2674_v6 = vpop.trf.xlu1 }
 0x6b7   :  { %v2706_v39 = vpop.trf.xlu0  ;;  %5231 = vmatmul.mubr.msk.f32.gmra.mrb[74].mxu0 %vm890_vm3, %v2674_v6 }
 0x6ba   :  { %v2675_v62 = vpop.trf.xlu1 }
 0x6bb   :  { %v2707_v24 = vpop.trf.xlu0  ;;  %5233 = vmatprep.mubr.msk.f32.mxu0 %vm890_vm3, %v2675_v62 }
 0x6be   :  { %v2676_v63 = vpop.trf.xlu1 }
 0x6bf   :  { %v2708_v4 = vpop.trf.xlu0  ;;  %5234 = vmatmul.mubr.msk.f32.gmra.mrb[76].mxu0 %vm890_vm3, %v2676_v63 }
 0x6c2   :  { %v2677_v5 = vpop.trf.xlu1 }
 0x6c3   :  { %v2709_v8 = vpop.trf.xlu0  ;;  %5236 = vmatprep.mubr.msk.f32.mxu0 %vm890_vm3, %v2677_v5 }
 0x6c6   :  { %v2678_v2 = vpop.trf.xlu1 }
 0x6c7   :  { %5237 = vmatmul.mubr.msk.f32.gmra.mrb[78].mxu0 %vm890_vm3, %v2678_v2  ;;  %v2710_v40 = vpop.trf.xlu0 }
 0x6c8   :  { %5239 = vmatprep.mubr.msk.f32.mxu0 %vm890_vm3, %v2695_v33 }
 0x6cb   :  { %5240 = vmatmul.mubr.msk.f32.gmra.mrb[80].mxu0 %vm890_vm3, %v2696_v32  ;;  %v3212_v27 = vpop.trf.xlu0 }
 0x6cc   :  { %5242 = vmatprep.mubr.msk.f32.mxu0 %vm890_vm3, %v2697_v57  ;;  %v2727_v3 = vpop.trf.xlu1  ;;  %5289 = vmatprep.mubr.msk.f32.mxu1 %vm890_vm3, %v3212_v27 }
 0x6cf   :  { %5243 = vmatmul.mubr.msk.f32.gmra.mrb[82].mxu0 %vm890_vm3, %v2698_v31  ;;  %v3213_v10 = vpop.trf.xlu0 }
 0x6d0   :  { %5245 = vmatprep.mubr.msk.f32.mxu0 %vm890_vm3, %v2699_v19  ;;  %v2728_v44 = vpop.trf.xlu1  ;;  %5290 = vmatmul.mubr.msk.f32.vlgmr.msra.gmra.mrb[70].mxu1 %vm890_vm3, %v3213_v10 }
 0x6d3   :  { %5246 = vmatmul.mubr.msk.f32.gmra.mrb[84].mxu0 %vm890_vm3, %v2700_v60  ;;  %v3214_v28 = vpop.trf.xlu0 }
 0x6d4   :  { %5248 = vmatprep.mubr.msk.f32.mxu0 %vm890_vm3, %v2701_v36  ;;  %v2729_v55 = vpop.trf.xlu1  ;;  %5292 = vmatprep.mubr.msk.f32.mxu1 %vm890_vm3, %v3214_v28 }
 0x6d7   :  { %5249 = vmatmul.mubr.msk.f32.gmra.mrb[86].mxu0 %vm890_vm3, %v2702_v29  ;;  %v3215_v20 = vpop.trf.xlu0 }
 0x6d8   :  { %5251 = vmatprep.mubr.msk.f32.mxu0 %vm890_vm3, %v2703_v52  ;;  %v2730_v33 = vpop.trf.xlu1  ;;  %5293 = vmatmul.mubr.msk.f32.gmra.mrb[72].mxu1 %vm890_vm3, %v3215_v20 }
 0x6db   :  { %5252 = vmatmul.mubr.msk.f32.gmra.mrb[88].mxu0 %vm890_vm3, %v2704_v46  ;;  %v3216_v15 = vpop.trf.xlu0 }
 0x6dc   :  { %5254 = vmatprep.mubr.msk.f32.mxu0 %vm890_vm3, %v2705_v16  ;;  %v2731_v32 = vpop.trf.xlu1  ;;  %5295 = vmatprep.mubr.msk.f32.mxu1 %vm890_vm3, %v3216_v15 }
 0x6df   :  { %5255 = vmatmul.mubr.msk.f32.gmra.mrb[90].mxu0 %vm890_vm3, %v2706_v39  ;;  %v3217_v59 = vpop.trf.xlu0 }
 0x6e0   :  { %5257 = vmatprep.mubr.msk.f32.mxu0 %vm890_vm3, %v2707_v24  ;;  %v2732_v57 = vpop.trf.xlu1  ;;  %5296 = vmatmul.mubr.msk.f32.gmra.mrb[74].mxu1 %vm890_vm3, %v3217_v59 }
 0x6e3   :  { %2491 = vrot.lane.b32.xlu1 %v6334_v1, %s5997_s4  ;;  %5258 = vmatmul.mubr.msk.f32.gmra.mrb[92].mxu0 %vm890_vm3, %v2708_v4  ;;  %v3218_v53 = vpop.trf.xlu0 }
 0x6e4   :  { %5260 = vmatprep.mubr.msk.f32.mxu0 %vm890_vm3, %v2709_v8  ;;  %v2733_v31 = vpop.trf.xlu1  ;;  %5298 = vmatprep.mubr.msk.f32.mxu1 %vm890_vm3, %v3218_v53 }
 0x6e7   :  { %5261 = vmatmul.mubr.msk.f32.gmra.mrb[94].mxu0 %vm890_vm3, %v2710_v40  ;;  %v3219_v43 = vpop.trf.xlu0 }
 0x6e8   :  { %v2734_v19 = vpop.trf.xlu1  ;;  %5299 = vmatmul.mubr.msk.f32.gmra.mrb[76].mxu1 %vm890_vm3, %v3219_v43  ;;  %5263 = vmatprep.mubr.msk.f32.mxu0 %vm890_vm3, %v2727_v3 }
 0x6ea   :  { %2489 = vrot.lane.b32.xlu0 %v6326_v49, %s5997_s4 }
 0x6eb   :  { %v3220_v1 = vpop.trf.xlu0  ;;  %5264 = vmatmul.mubr.msk.f32.gmra.mrb[96].mxu0 %vm890_vm3, %v2728_v44 }
 0x6ec   :  { %v2735_v13 = vpop.trf.xlu1  ;;  %5301 = vmatprep.mubr.msk.f32.mxu1 %vm890_vm3, %v3220_v1  ;;  %5266 = vmatprep.mubr.msk.f32.mxu0 %vm890_vm3, %v2729_v55 }
 0x6ef   :  { %v3221_v60 = vpop.trf.xlu0  ;;  %5267 = vmatmul.mubr.msk.f32.gmra.mrb[98].mxu0 %vm890_vm3, %v2730_v33 }
 0x6f0   :  { %v2736_v18 = vpop.trf.xlu1  ;;  %5302 = vmatmul.mubr.msk.f32.gmra.mrb[78].mxu1 %vm890_vm3, %v3221_v60  ;;  %5269 = vmatprep.mubr.msk.f32.mxu0 %vm890_vm3, %v2731_v32 }
 0x6f3   :  { %v3222_v36 = vpop.trf.xlu0  ;;  %5270 = vmatmul.mubr.msk.f32.gmra.mrb[100].mxu0 %vm890_vm3, %v2732_v57 }
 0x6f4   :  { %v2737_v49 = vpop.trf.xlu1  ;;  %5304 = vmatprep.mubr.msk.f32.mxu1 %vm890_vm3, %v3222_v36  ;;  %5272 = vmatprep.mubr.msk.f32.mxu0 %vm890_vm3, %v2733_v31 }
 0x6f7   :  { %v3223_v30 = vpop.trf.xlu0  ;;  %5273 = vmatmul.mubr.msk.f32.gmra.mrb[102].mxu0 %vm890_vm3, %v2734_v19 }
 0x6f8   :  { %v2738_v29 = vpop.trf.xlu1  ;;  %5305 = vmatmul.mubr.msk.f32.gmra.mrb[80].mxu1 %vm890_vm3, %v3223_v30  ;;  %5275 = vmatprep.mubr.msk.f32.mxu0 %vm890_vm3, %v2735_v13 }
 0x6fb   :  { %v3224_v35 = vpop.trf.xlu0  ;;  %5276 = vmatmul.mubr.msk.f32.gmra.mrb[104].mxu0 %vm890_vm3, %v2736_v18 }
 0x6fc   :  { %v2739_v52 = vpop.trf.xlu1  ;;  %5307 = vmatprep.mubr.msk.f32.mxu1 %vm890_vm3, %v3224_v35  ;;  %5278 = vmatprep.mubr.msk.f32.mxu0 %vm890_vm3, %v2737_v49 }
 0x6ff   :  { %v3225_v34 = vpop.trf.xlu0  ;;  %5279 = vmatmul.mubr.msk.f32.gmra.mrb[106].mxu0 %vm890_vm3, %v2738_v29 }
 0x700   :  { %v2740_v46 = vpop.trf.xlu1  ;;  %5308 = vmatmul.mubr.msk.f32.gmra.mrb[82].mxu1 %vm890_vm3, %v3225_v34  ;;  %5281 = vmatprep.mubr.msk.f32.mxu0 %vm890_vm3, %v2739_v52 }
 0x703   :  { %v3226_v37 = vpop.trf.xlu0  ;;  %5282 = vmatmul.mubr.msk.f32.gmra.mrb[108].mxu0 %vm890_vm3, %v2740_v46 }
 0x704   :  { %v2741_v16 = vpop.trf.xlu1  ;;  %5310 = vmatprep.mubr.msk.f32.mxu1 %vm890_vm3, %v3226_v37 }
 0x705   :  { %5284 = vmatprep.mubr.msk.f32.mxu0 %vm890_vm3, %v2741_v16 }
 0x707   :  { %v3227_v6 = vpop.trf.xlu0 }
 0x708   :  { %v2742_v39 = vpop.trf.xlu1  ;;  %5311 = vmatmul.mubr.msk.f32.gmra.mrb[84].mxu1 %vm890_vm3, %v3227_v6 }
 0x709   :  { %2527 = vmax.xlane.f32.xlu0 %v6680_v56  ;;  %5285 = vmatmul.mubr.msk.f32.gmra.mrb[110].mxu0 %vm890_vm3, %v2742_v39 }
 0x70b   :  { %v3244_v62 = vpop.trf.xlu0 }
 0x70c   :  { %v3276_v24 = vpop.trf.xlu1  ;;  %5313 = vmatprep.mubr.msk.f32.mxu1 %vm890_vm3, %v3244_v62 }
 0x70d   :  { %2531 = vmax.xlane.f32.xlu0 %v6677_v54 }
 0x70f   :  { %v3245_v63 = vpop.trf.xlu0 }
 0x710   :  { %v3277_v4 = vpop.trf.xlu1  ;;  %5314 = vmatmul.mubr.msk.f32.gmra.mrb[86].mxu1 %vm890_vm3, %v3245_v63 }
 0x713   :  { %v3246_v5 = vpop.trf.xlu0 }
 0x714   :  { %v3278_v8 = vpop.trf.xlu1  ;;  %5316 = vmatprep.mubr.msk.f32.mxu1 %vm890_vm3, %v3246_v5 }
 0x717   :  { %v3247_v2 = vpop.trf.xlu0 }
 0x718   :  { %v3279_v40 = vpop.trf.xlu1  ;;  %5317 = vmatmul.mubr.msk.f32.gmra.mrb[88].mxu1 %vm890_vm3, %v3247_v2 }
 0x71b   :  { %v3248_v56 = vpop.trf.xlu0 }
 0x71c   :  { %v3280_v27 = vpop.trf.xlu1  ;;  %5319 = vmatprep.mubr.msk.f32.mxu1 %vm890_vm3, %v3248_v56 }
 0x71f   :  { %v3249_v3 = vpop.trf.xlu0 }
 0x720   :  { %v3281_v10 = vpop.trf.xlu1  ;;  %5320 = vmatmul.mubr.msk.f32.gmra.mrb[90].mxu1 %vm890_vm3, %v3249_v3 }
 0x723   :  { %v3250_v54 = vpop.trf.xlu0 }
 0x724   :  { %v3282_v44 = vpop.trf.xlu1  ;;  %5322 = vmatprep.mubr.msk.f32.mxu1 %vm890_vm3, %v3250_v54 }
 0x727   :  { %v3251_v28 = vpop.trf.xlu0 }
 0x728   :  { %v3283_v55 = vpop.trf.xlu1  ;;  %5323 = vmatmul.mubr.msk.f32.gmra.mrb[92].mxu1 %vm890_vm3, %v3251_v28 }
 0x72b   :  { %v3252_v20 = vpop.trf.xlu0 }
 0x72c   :  { %5325 = vmatprep.mubr.msk.f32.mxu1 %vm890_vm3, %v3252_v20  ;;  %v3284_v33 = vpop.trf.xlu1 }
 0x72f   :  { %v3253_v15 = vpop.trf.xlu0 }
 0x730   :  { %5326 = vmatmul.mubr.msk.f32.gmra.mrb[94].mxu1 %vm890_vm3, %v3253_v15  ;;  %v3285_v59 = vpop.trf.xlu1 }
 0x733   :  { %v3254_v32 = vpop.trf.xlu0 }
 0x734   :  { %5328 = vmatprep.mubr.msk.f32.mxu1 %vm890_vm3, %v3254_v32  ;;  %v3286_v53 = vpop.trf.xlu1 }
 0x737   :  { %v3255_v57 = vpop.trf.xlu0 }
 0x738   :  { %5329 = vmatmul.mubr.msk.f32.gmra.mrb[96].mxu1 %vm890_vm3, %v3255_v57  ;;  %v3287_v19 = vpop.trf.xlu1 }
 0x73b   :  { %v3256_v31 = vpop.trf.xlu0 }
 0x73c   :  { %5331 = vmatprep.mubr.msk.f32.mxu1 %vm890_vm3, %v3256_v31  ;;  %v3288_v13 = vpop.trf.xlu1 }
 0x73f   :  { %v3257_v43 = vpop.trf.xlu0 }
 0x740   :  { %5332 = vmatmul.mubr.msk.f32.gmra.mrb[98].mxu1 %vm890_vm3, %v3257_v43  ;;  %v3289_v18 = vpop.trf.xlu1 }
 0x743   :  { %v3258_v1 = vpop.trf.xlu0 }
 0x744   :  { %5334 = vmatprep.mubr.msk.f32.mxu1 %vm890_vm3, %v3258_v1  ;;  %v3290_v36 = vpop.trf.xlu1 }
 0x747   :  { %v3259_v60 = vpop.trf.xlu0 }
 0x748   :  { %5335 = vmatmul.mubr.msk.f32.gmra.mrb[100].mxu1 %vm890_vm3, %v3259_v60  ;;  %v3291_v49 = vpop.trf.xlu1 }
 0x749   :  { %5337 = vmatprep.mubr.msk.f32.mxu1 %vm890_vm3, %v3276_v24 }
 0x74c   :  { %5338 = vmatmul.mubr.msk.f32.gmra.mrb[102].mxu1 %vm890_vm3, %v3277_v4 }
 0x74d   :  { %5340 = vmatprep.mubr.msk.f32.mxu1 %vm890_vm3, %v3278_v8 }
 0x750   :  { %5341 = vmatmul.mubr.msk.f32.gmra.mrb[104].mxu1 %vm890_vm3, %v3279_v40 }
 0x751   :  { %5343 = vmatprep.mubr.msk.f32.mxu1 %vm890_vm3, %v3280_v27 }
 0x754   :  { %5344 = vmatmul.mubr.msk.f32.gmra.mrb[106].mxu1 %vm890_vm3, %v3281_v10 }
 0x755   :  { %5346 = vmatprep.mubr.msk.f32.mxu1 %vm890_vm3, %v3282_v44  ;;  %v2492_v35 = vpop.permute.xlu1 %2491 }
 0x756   :  { %v2498_v52 = vsel %vm329_vm1, %v2492_v35, 0.0 }
 0x758   :  { %5347 = vmatmul.mubr.msk.f32.gmra.mrb[108].mxu1 %vm890_vm3, %v3283_v55 }
 0x759   :  { %5349 = vmatprep.mubr.msk.f32.mxu1 %vm890_vm3, %v3284_v33 }
 0x75c   :  { %5350 = vmatmul.mubr.msk.f32.gmra.mrb[110].mxu1 %vm890_vm3, %v3285_v59  ;;  %v2490_v30 = vpop.permute.xlu0 %2489 }
 0x75d   :  { %v2495_v29 = vsel %vm329_vm1, %v2490_v30, 0.0  ;;  %5352 = vmatprep.mubr.msk.f32.mxu1 %vm890_vm3, %v3286_v53 }
 0x75e   :  { %2496 = vadd.xlane.f32.xlu1 %v2495_v29 }
 0x760   :  { %5353 = vmatmul.mubr.msk.f32.gmra.mrb[112].mxu1 %vm890_vm3, %v3287_v19 }
 0x761   :  { %5355 = vmatprep.mubr.msk.f32.mxu1 %vm890_vm3, %v3288_v13 }
 0x762   :  { %2499 = vadd.xlane.f32.xlu1 %v2498_v52  ;;  %v5217_v34 = vpop.f32.mrb[64].mxu0 }
 0x763   :  { %v2957_v46 = vpop.f32.mrb[65].mxu0 }
 0x764   :  { %5356 = vmatmul.mubr.msk.f32.gmra.mrb[114].mxu1 %vm890_vm3, %v3289_v18  ;;  %v5727_v37 = vpack.c.bf16 %v5217_v34, %v2957_v46 }
 0x765   :  { %5358 = vmatprep.mubr.msk.f32.mxu1 %vm890_vm3, %v3290_v36 }
 0x768   :  { %5359 = vmatmul.mubr.msk.f32.gmra.mrb[116].mxu1 %vm890_vm3, %v3291_v49 }
 0x769   :  { %5393 = vmatprep.mubr.msk.f32.mxu1 %vm5999_vm4, %v7036_v21 }
 0x76a   :  { %v5220_v16 = vpop.f32.mrb[66].mxu0 }
 0x76b   :  { %v2967_v6 = vpop.f32.mrb[67].mxu0 }
 0x76c   :  { %v5731_v39 = vpack.c.bf16 %v5220_v16, %v2967_v6 }
 0x772   :  { %v5223_v62 = vpop.f32.mrb[68].mxu0 }
 0x773   :  { %v2977_v24 = vpop.f32.mrb[69].mxu0 }
 0x774   :  { %v5735_v63 = vpack.c.bf16 %v5223_v62, %v2977_v24 }
 0x77a   :  { %v5226_v4 = vpop.f32.mrb[70].mxu0 }
 0x77b   :  { %v2987_v5 = vpop.f32.mrb[71].mxu0 }
 0x77c   :  { %v5739_v8 = vpack.c.bf16 %v5226_v4, %v2987_v5 }
 0x782   :  { %v5229_v2 = vpop.f32.mrb[72].mxu0 }
 0x783   :  { %v2997_v40 = vpop.f32.mrb[73].mxu0 }
 0x784   :  { %v5743_v56 = vpack.c.bf16 %v5229_v2, %v2997_v40 }
 0x78a   :  { %v5232_v27 = vpop.f32.mrb[74].mxu0 }
 0x78b   :  { %v3007_v3 = vpop.f32.mrb[75].mxu0 }
 0x78c   :  { %v5747_v10 = vpack.c.bf16 %v5232_v27, %v3007_v3 }
 0x792   :  { %v5235_v54 = vpop.f32.mrb[76].mxu0 }
 0x793   :  { %v3017_v44 = vpop.f32.mrb[77].mxu0 }
 0x794   :  { %v5751_v28 = vpack.c.bf16 %v5235_v54, %v3017_v44 }
 0x79a   :  { %v5238_v55 = vpop.f32.mrb[78].mxu0 }
 0x79b   :  { %v3027_v20 = vpop.f32.mrb[79].mxu0 }
 0x79c   :  { %v5755_v33 = vpack.c.bf16 %v5238_v55, %v3027_v20 }
 0x79e   :  { %v5241_v15 = vpop.f32.mrb[80].mxu0 }
 0x79f   :  { %v3037_v32 = vpop.f32.mrb[81].mxu0 }
 0x7a0   :  { %v5725_v59 = vpack.c.bf16 %v5241_v15, %v3037_v32 }
 0x7a2   :  { %v5244_v57 = vpop.f32.mrb[82].mxu0  ;;  %5726 = vmatprep.subr.bf16.mxu0 %v5725_v59 }
 0x7a3   :  { %v3047_v53 = vpop.f32.mrb[83].mxu0  ;;  %5728 = vmatpush3.bf16.msra.mxu0 %v5727_v37  ;;  %v6802_v31 = vpop.f32.mrb[70].mxu1 }
 0x7a4   :  { %v5729_v43 = vpack.c.bf16 %v5244_v57, %v3047_v53  ;;  %v6804_v19 = vpop.f32.mrb[71].mxu1 }
 0x7a6   :  { %v5247_v13 = vpop.f32.mrb[84].mxu0  ;;  %5730 = vmatprep.subr.bf16.mxu0 %v5729_v43 }
 0x7a7   :  { %v3057_v60 = vpop.f32.mrb[85].mxu0  ;;  %5732 = vmatpush3.bf16.msra.mxu0 %v5731_v39 }
 0x7a8   :  { %v5733_v18 = vpack.c.bf16 %v5247_v13, %v3057_v60 }
 0x7aa   :  { %v5250_v36 = vpop.f32.mrb[86].mxu0  ;;  %5734 = vmatprep.subr.bf16.mxu0 %v5733_v18 }
 0x7ab   :  { %v3067_v49 = vpop.f32.mrb[87].mxu0  ;;  %5736 = vmatpush3.bf16.msra.mxu0 %v5735_v63  ;;  %v6808_v30 = vpop.f32.mrb[72].mxu1 }
 0x7ac   :  { %v5737_v29 = vpack.c.bf16 %v5250_v36, %v3067_v49  ;;  %v6810_v35 = vpop.f32.mrb[73].mxu1 }
 0x7ae   :  { %v5253_v34 = vpop.f32.mrb[88].mxu0  ;;  %5738 = vmatprep.subr.bf16.mxu0 %v5737_v29 }
 0x7af   :  { %v3077_v46 = vpop.f32.mrb[89].mxu0  ;;  %5740 = vmatpush3.bf16.msra.mxu0 %v5739_v8 }
 0x7b0   :  { %v5741_v37 = vpack.c.bf16 %v5253_v34, %v3077_v46 }
 0x7b2   :  { %v5256_v16 = vpop.f32.mrb[90].mxu0  ;;  %5742 = vmatprep.subr.bf16.mxu0 %v5741_v37 }
 0x7b3   :  { %v3087_v6 = vpop.f32.mrb[91].mxu0  ;;  %5744 = vmatpush3.bf16.msra.mxu0 %v5743_v56  ;;  %v6814_v39 = vpop.f32.mrb[74].mxu1 }
 0x7b4   :  { %v5745_v62 = vpack.c.bf16 %v5256_v16, %v3087_v6  ;;  %v6816_v24 = vpop.f32.mrb[75].mxu1 }
 0x7b6   :  { %v5259_v4 = vpop.f32.mrb[92].mxu0  ;;  %5746 = vmatprep.subr.bf16.mxu0 %v5745_v62 }
 0x7b7   :  { %v3097_v5 = vpop.f32.mrb[93].mxu0  ;;  %5748 = vmatpush3.bf16.msra.mxu0 %v5747_v10 }
 0x7b8   :  { %v5749_v2 = vpack.c.bf16 %v5259_v4, %v3097_v5 }
 0x7ba   :  { %v5262_v40 = vpop.f32.mrb[94].mxu0  ;;  %5750 = vmatprep.subr.bf16.mxu0 %v5749_v2 }
 0x7bb   :  { %v3107_v8 = vpop.f32.mrb[95].mxu0  ;;  %5752 = vmatpush3.bf16.msra.mxu0 %v5751_v28  ;;  %v6820_v27 = vpop.f32.mrb[76].mxu1 }
 0x7bc   :  { %v5753_v56 = vpack.c.bf16 %v5262_v40, %v3107_v8  ;;  %v6822_v3 = vpop.f32.mrb[77].mxu1 }
 0x7be   :  { %5754 = vmatprep.subr.bf16.mxu0 %v5753_v56  ;;  %v5265_v44 = vpop.f32.mrb[96].mxu0 }
 0x7bf   :  { %5756 = vmatpush3.bf16.msra.mxu0 %v5755_v33  ;;  %v3117_v55 = vpop.f32.mrb[97].mxu0 }
 0x7c0   :  { %v5758_v20 = vpack.c.bf16 %v5265_v44, %v3117_v55 }
 0x7c2   :  { %5759 = vmatpush3.bf16.msra.mxu1 %v5758_v20  ;;  %v5268_v10 = vpop.f32.mrb[98].mxu0 }
 0x7c3   :  { %v6826_v15 = vpop.f32.mrb[78].mxu1  ;;  %v3127_v32 = vpop.f32.mrb[99].mxu0  ;;  %5760 = vmatprep.subr.bf16.mxu1 %v7041_v42 }
 0x7c4   :  { %v6829_v28 = vpop.f32.mrb[79].mxu1  ;;  %v5761_v59 = vpack.c.bf16 %v5268_v10, %v3127_v32  ;;  %v770_v10 = vrot.slane %v6269_v9, 4 }
 0x7c6   :  { %v5271_v53 = vpop.f32.mrb[100].mxu0  ;;  %5762 = vmatpush3.bf16.msra.mxu1 %v5761_v59 }
 0x7c7   :  { %v3137_v43 = vpop.f32.mrb[101].mxu0  ;;  %5763 = vmatprep.subr.bf16.mxu1 %v7041_v42 }
 0x7c8   :  { %v5764_v33 = vpack.c.bf16 %v5271_v53, %v3137_v43 }
 0x7ca   :  { %v5274_v13 = vpop.f32.mrb[102].mxu0  ;;  %5765 = vmatpush3.bf16.msra.mxu1 %v5764_v33 }
 0x7cb   :  { %v6834_v60 = vpop.f32.mrb[80].mxu1  ;;  %v3147_v18 = vpop.f32.mrb[103].mxu0  ;;  %5766 = vmatprep.subr.bf16.mxu1 %v7041_v42 }
 0x7cc   :  { %v6837_v36 = vpop.f32.mrb[81].mxu1  ;;  %v5767_v49 = vpack.c.bf16 %v5274_v13, %v3147_v18  ;;  %v2593_v13 = vrot.slane %v6658_v47, 4 }
 0x7ce   :  { %v5277_v34 = vpop.f32.mrb[104].mxu0  ;;  %5768 = vmatpush3.bf16.msra.mxu1 %v5767_v49 }
 0x7cf   :  { %v3157_v46 = vpop.f32.mrb[105].mxu0  ;;  %5769 = vmatprep.subr.bf16.mxu1 %v7041_v42 }
 0x7d0   :  { %v5770_v37 = vpack.c.bf16 %v5277_v34, %v3157_v46 }
 0x7d2   :  { %v5280_v16 = vpop.f32.mrb[106].mxu0  ;;  %5771 = vmatpush3.bf16.msra.mxu1 %v5770_v37  ;;  %v2599_v37 = vrot.slane %v6660_v25, 4 }
 0x7d3   :  { %v6842_v6 = vpop.f32.mrb[82].mxu1  ;;  %v3167_v62 = vpop.f32.mrb[107].mxu0  ;;  %5772 = vmatprep.subr.bf16.mxu1 %v7041_v42 }
 0x7d4   :  { %v6845_v4 = vpop.f32.mrb[83].mxu1  ;;  %v5773_v5 = vpack.c.bf16 %v5280_v16, %v3167_v62  ;;  %v2528_v16 = vpop.xlane.xlu0 %2527  ;;  %v2600_v2 = vadd.f32 %v2599_v37, %v6660_v25  ;;  %v2623_v25 = vrot.slane %v6693_v22, 4 }
 0x7d6   :  { %v5283_v40 = vpop.f32.mrb[108].mxu0  ;;  %5774 = vmatpush3.bf16.msra.mxu1 %v5773_v5 }
 0x7d7   :  { %v3177_v8 = vpop.f32.mrb[109].mxu0  ;;  %5775 = vmatprep.subr.bf16.mxu1 %v7041_v42 }
 0x7d8   :  { %v5776_v56 = vpack.c.bf16 %v5283_v40, %v3177_v8  ;;  %v2532_v57 = vpop.xlane.xlu0 %2531 }
 0x7da   :  { %5777 = vmatpush3.bf16.msra.mxu1 %v5776_v56  ;;  %v2594_v56 = vadd.f32 %v2593_v13, %v6658_v47 }
 0x7db   :  { %v6850_v44 = vpop.f32.mrb[84].mxu1  ;;  %5778 = vmatprep.subr.bf16.mxu1 %v7041_v42 }
 0x7dc   :  { %v6853_v55 = vpop.f32.mrb[85].mxu1  ;;  %v5286_v20 = vpop.f32.mrb[110].mxu0  ;;  %v2595_v13 = vrot.slane %v2594_v56, 2 }
 0x7dd   :  { %v3187_v32 = vpop.f32.mrb[111].mxu0 }
 0x7de   :  { %v5779_v59 = vpack.c.bf16 %v5286_v20, %v3187_v32  ;;  %v2611_v20 = vrot.slane %v6684_v11, 4  ;;  %v2605_v32 = vrot.slane %v6687_v38, 4 }
 0x7e0   :  { %5780 = vmatpush3.bf16.msra.mxu1 %v5779_v59 }
 0x7e1   :  { %5813 = vmatprep.subr.bf16.mxu1 %v7041_v42 }
 0x7e3   :  { %v5315_v53 = vpop.f32.mrb[86].mxu1 }
 0x7e4   :  { %v3586_v43 = vpop.f32.mrb[87].mxu1 }
 0x7e5   :  { %v5781_v33 = vpack.c.bf16 %v5315_v53, %v3586_v43 }
 0x7e7   :  { %5782 = vmatprep.subr.bf16.mxu0 %v5781_v33 }
 0x7eb   :  { %v2497_v18 = vpop.xlane.xlu1 %2496  ;;  %v6859_v49 = vpop.f32.mrb[88].mxu1 }
 0x7ec   :  { %v2501_v34 = vmul.f32 0.0625, %v2497_v18  ;;  %v6861_v46 = vpop.f32.mrb[89].mxu1 }
 0x7ee   :  { %v2519_v5 = vsub.f32 %v6647_v0, %v2501_v34  ;;  %v2520_v40 = vsub.f32 %v6649_v41, %v2501_v34  ;;  %v2521_v8 = vsub.f32 %v6670_v17, %v2501_v34  ;;  %v2617_v0 = vrot.slane %v6690_v51, 4 }
 0x7ef   :  { %v2500_v59 = vpop.xlane.xlu1 %2499  ;;  %v2612_v34 = vadd.f32 %v2611_v20, %v6684_v11 }
 0x7f0   :  { %v2533_v53 = vsub.f32 %v2519_v5, %v2528_v16  ;;  %v2534_v43 = vsub.f32 %v2520_v40, %v2528_v16  ;;  %v2535_v33 = vsub.f32 %v2521_v8, %v2528_v16  ;;  %v2502_v18 = vmul.f32 0.0625, %v2500_v59 }
 0x7f1   :  { %v2606_v8 = vadd.f32 %v2605_v32, %v6687_v38 }
 0x7f2   :  { %v2539_v41 = vmul.f32 1.442695, %v2533_v53  ;;  %v2541_v29 = vmul.f32 1.442695, %v2534_v43  ;;  %v2543_v17 = vmul.f32 1.442695, %v2535_v33  ;;  %v2522_v47 = vsub.f32 %v6651_v26, %v2502_v18 }
 0x7f3   :  { %v2523_v5 = vsub.f32 %v6653_v45, %v2502_v18  ;;  %v2524_v16 = vsub.f32 %v6667_v48, %v2502_v18  ;;  %v6879_v40 = vpop.f32.mrb[90].mxu1  ;;  %v752_v45 = vrot.slane %v6267_v7, 4  ;;  %v2618_v48 = vadd.f32 %v2617_v0, %v6690_v51 }
 0x7f4   :  { %5922 = vpow2.f32 %v2539_v41  ;;  %v2536_v37 = vsub.f32 %v2522_v47, %v2532_v57  ;;  %v6883_v59 = vpop.f32.mrb[91].mxu1  ;;  %v2601_v43 = vrot.slane %v2600_v2, 2  ;;  %v2613_v33 = vrot.slane %v2612_v34, 2 }
 0x7f5   :  { %5924 = vpow2.f32 %v2543_v17  ;;  %v2537_v26 = vsub.f32 %v2523_v5, %v2532_v57  ;;  %v2538_v53 = vsub.f32 %v2524_v16, %v2532_v57  ;;  %v2607_v18 = vrot.slane %v2606_v8, 2 }
 0x7f6   :  { %v2545_v20 = vmul.f32 1.442695, %v2536_v37  ;;  %5926 = vpow2.f32 %v2541_v29  ;;  %v2624_v41 = vadd.f32 %v2623_v25, %v6693_v22  ;;  %v2596_v17 = vadd.f32 %v2595_v13, %v2594_v56 }
 0x7f7   :  { %v2547_v38 = vmul.f32 1.442695, %v2537_v26  ;;  %v2549_v32 = vmul.f32 1.442695, %v2538_v53  ;;  %v753_v57 = vadd.f32 %v752_v45, %v6267_v7  ;;  %v771_v47 = vadd.f32 %v770_v10, %v6269_v9 }
 0x7f8   :  { %5928 = vpow2.f32 %v2545_v20  ;;  %v2619_v5 = vrot.slane %v2618_v48, 2  ;;  %v2602_v16 = vadd.f32 %v2601_v43, %v2600_v2  ;;  %v2614_v29 = vadd.f32 %v2613_v33, %v2612_v34 }
 0x7f9   :  { %5930 = vpow2.f32 %v2549_v32  ;;  %v2625_v0 = vrot.slane %v2624_v41, 2  ;;  %v2608_v37 = vadd.f32 %v2607_v18, %v2606_v8  ;;  %v2597_v53 = vrot.slane %v2596_v17, 1 }
 0x7fa   :  { %5932 = vpow2.f32 %v2547_v38  ;;  %v754_v13 = vrot.slane %v753_v57, 2  ;;  %v772_v25 = vrot.slane %v771_v47, 2  ;;  %v2620_v7 = vadd.f32 %v2619_v5, %v2618_v48 }
 0x7fb   :  { %v6892_v51 = vpop.f32.mrb[92].mxu1  ;;  %v2603_v10 = vrot.slane %v2602_v16, 1  ;;  %v2609_v43 = vrot.slane %v2608_v37, 1  ;;  %v2615_v38 = vrot.slane %v2614_v29, 1  ;;  %v2626_v34 = vadd.f32 %v2625_v0, %v2624_v41 }
 0x7fc   :  { %v6894_v26 = vpop.f32.mrb[93].mxu1  ;;  %v2598_v33 = vadd.f32 %v2597_v53, %v2596_v17  ;;  %v2621_v63 = vrot.slane %v2620_v7, 1  ;;  %v755_v11 = vadd.f32 %v754_v13, %v753_v57  ;;  %v773_v22 = vadd.f32 %v772_v25, %v771_v47 }
 0x7fd   :  { %v2604_v1 = vadd.f32 %v2603_v10, %v2602_v16  ;;  %v2616_v12 = vadd.f32 %v2615_v38, %v2614_v29  ;;  %v2627_v41 = vrot.slane %v2626_v34, 1  ;;  %v7044_v57 = vmov 0.0  }
 0x7fe   :  { %v5923_v56 = vpop.eup %5922  ;;  %v2622_v47 = vadd.f32 %v2621_v63, %v2620_v7  ;;  %v756_v13 = vrot.slane %v755_v11, 1  ;;  %v7045_v25 = vpack.c.bf16 %v6802_v31, %v6804_v19  ;;  %v774_v63 = vrot.slane %v773_v22, 1 }
 0x7ff   :  { %v5925_v45 = vpop.eup %5924  ;;  %v2551_v9 = vadd.f32 0.0001, %v5923_v56  ;;  %v7047_v7 = vpack.c.bf16 %v6808_v30, %v6810_v35  ;;  %v7049_v30 = vpack.c.bf16 %v6814_v39, %v6816_v24  ;;  %v7052_v24 = vpack.c.bf16 %v6826_v15, %v6829_v28 }
 0x800   :  { %v5927_v20 = vpop.eup %5926  ;;  %v2553_v2 = vadd.f32 0.0001, %v5925_v45  ;;  %v2610_v45 = vadd.f32 %v2609_v43, %v2608_v37  ;;  %v775_v38 = vadd.f32 %v774_v63, %v773_v22  ;;  %v7055_v15 = vpack.c.bf16 %v6850_v44, %v6853_v55  ;;  %v303_v63 = vld [vmem:[%s7030_s5] sm:$0xff] }
 0x801   :  { %v2557_v32 = vmul.f32 0.061313935, %v2551_v9  ;;  %v2552_v8 = vadd.f32 0.0001, %v5927_v20 }
 0x802   :  { %v5929_v18 = vpop.eup %5928  ;;  %v2559_v54 = vmul.f32 0.061313935, %v2553_v2  ;;  %v2628_v2 = vadd.f32 %v2627_v41, %v2626_v34  ;;  %v781_v35 = vmul.f32 %v775_v38, %v6618_v58  ;;  %v7053_v58 = vpack.c.bf16 %v6834_v60, %v6837_v36 }
 0x803   :  { %v5931_v52 = vpop.eup %5930  ;;  %v2558_v62 = vmul.f32 0.061313935, %v2552_v8  ;;  %v2629_v48 = vmul.f32 %v2598_v33, %v2557_v32  ;;  %v2554_v5 = vadd.f32 0.0001, %v5929_v18  ;;  %v5327_v56 = vpop.f32.mrb[94].mxu1 }
 0x804   :  { %v5933_v21 = vpop.eup %5932  ;;  %5394 = vmatmul.mubr.f32.vlgmr.msra.gmra.mrb[118].mxu1 %v2559_v54  ;;  %v2556_v14 = vadd.f32 0.0001, %v5931_v52  ;;  %v3626_v0 = vpop.f32.mrb[95].mxu1  ;;  %v2631_v16 = vmul.f32 %v2610_v45, %v2559_v54  ;;  %v757_v54 = vadd.f32 %v756_v13, %v755_v11  ;;  %v312_v13 = vld [vmem:[%s7030_s5 + $0x48] sm:$0xff] }
 0x805   :  { %v2630_v9 = vmul.f32 %v2604_v1, %v2558_v62  ;;  %3809 = vmatprep.mubr.f32.mxu0 %v2558_v62  ;;  %v2555_v17 = vadd.f32 0.0001, %v5933_v21  ;;  %v2560_v53 = vmul.f32 0.061313935, %v2554_v5  ;;  %v5797_v20 = vpack.c.bf16 %v5327_v56, %v3626_v0  ;;  %5428 = vmatprep.mubr.msk.f32.mxu1 %vm5999_vm4, %v7044_v57 }
 0x806   :  { %3810 = vmatmul.mubr.f32.vlgmr.msra.gmra.mrb[112].mxu0 %v2557_v32  ;;  %v6903_v37 = vmul.f32 0.061313935, %v2556_v14  ;;  %v7046_v21 = vpack.c.bf16 %v6859_v49, %v6861_v46  ;;  %v778_v49 = vmul.f32 %v757_v54, %v6588_v50  ;;  %v787_v50 = vadd.f32 %v6492_v23, %v781_v35  ;;  %v304_v54 = vld [vmem:[%s7030_s5 + $0x8] sm:$0xff] }
 0x807   :  { %5784 = vmatpush3.bf16.msra.mxu0 %v7045_v25  ;;  %v2561_v52 = vmul.f32 0.061313935, %v2555_v17  ;;  %v2635_v29 = vadd.f32 %v2630_v9, %v2629_v48  ;;  %v2632_v1 = vmul.f32 %v2616_v12, %v2560_v53  ;;  %v7048_v12 = vpack.c.bf16 %v6879_v40, %v6883_v59  ;;  %v313_v25 = vld [vmem:[%s7030_s5 + $0x50] sm:$0xff] }
 0x808   :  { %5786 = vmatprep.subr.bf16.mxu0 %v7046_v21  ;;  %v2634_v31 = vmul.f32 %v2628_v2, %v6903_v37  ;;  %v783_v11 = vadd.f32 %v6488_v61, %v778_v49  ;;  %v7050_v40 = vpack.c.bf16 %v6892_v51, %v6894_v26  ;;  %v7051_v59 = vpack.c.bf16 %v6820_v27, %v6822_v3 }
 0x809   :  { %v2633_v62 = vmul.f32 %v2622_v47, %v2561_v52  ;;  %3949 = vmatprep.mubr.f32.mxu0 %v2561_v52  ;;  %v2636_v10 = vadd.f32 %v2635_v29, %v2631_v16  ;;  %v7054_v27 = vpack.c.bf16 %v6842_v6, %v6845_v4  ;;  %v311_v16 = vld [vmem:[%s7030_s5 + $0x40] sm:$0xff] }
 0x80a   :  { %v5837_v52 = vpack.c.bf16 %v312_v13, %v311_v16 }
 0x80b   :  { %5788 = vmatpush3.bf16.msra.mxu0 %v7047_v7  ;;  %2637 = vadd.xlane.f32.xlu1 %v2636_v10  ;;  %v2639_v14 = vadd.f32 %v2633_v62, %v2632_v1  ;;  %v5330_v19 = vpop.f32.mrb[96].mxu1  ;;  %v316_v1 = vld [vmem:[%s7030_s5 + $0x68] sm:$0xff]  ;;  %v317_v62 = vld [vmem:[%s7030_s5 + $0x70] sm:$0xff]  ;;  %v318_v10 = vld [vmem:[%s7030_s5 + $0x78] sm:$0xff]  ;;  %v5853_v7 = vpack.c.bf16 %v304_v54, %v303_v63 }
 0x80c   :  { %5790 = vmatprep.subr.bf16.mxu0 %v7048_v12  ;;  %v3636_v46 = vpop.f32.mrb[97].mxu1  ;;  %v5849_v2 = vpack.c.bf16 %v318_v10, %v317_v62 }
 0x80d   :  { %v2640_v43 = vadd.f32 %v2639_v14, %v2634_v31  ;;  %v5801_v34 = vpack.c.bf16 %v5330_v19, %v3636_v46 }
 0x80f   :  { %5792 = vmatpush3.bf16.msra.mxu0 %v7049_v30  ;;  %2641 = vadd.xlane.f32.xlu0 %v2640_v43 }
 0x810   :  { %784 = vadd.xlane.f32.xlu1 %v783_v11  ;;  %5794 = vmatprep.subr.bf16.mxu0 %v7050_v40 }
 0x813   :  { %5796 = vmatpush3.bf16.msra.mxu0 %v7051_v59  ;;  %788 = vadd.xlane.f32.xlu0 %v787_v50  ;;  %v5333_v61 = vpop.f32.mrb[98].mxu1 }
 0x814   :  { %5798 = vmatprep.subr.bf16.mxu0 %v5797_v20  ;;  %v3646_v22 = vpop.f32.mrb[99].mxu1 }
 0x815   :  { %v5805_v39 = vpack.c.bf16 %v5333_v61, %v3646_v22 }
 0x817   :  { %5800 = vmatpush3.bf16.msra.mxu0 %v7052_v24 }
 0x818   :  { %5802 = vmatprep.subr.bf16.mxu0 %v5801_v34 }
 0x81b   :  { %5804 = vmatpush3.bf16.msra.mxu0 %v7053_v58  ;;  %v5336_v51 = vpop.f32.mrb[100].mxu1  ;;  %v305_v58 = vld [vmem:[%s7030_s5 + $0x10] sm:$0xff] }
 0x81c   :  { %5806 = vmatprep.subr.bf16.mxu0 %v5805_v39  ;;  %v3656_v23 = vpop.f32.mrb[101].mxu1 }
 0x81d   :  { %v5809_v26 = vpack.c.bf16 %v5336_v51, %v3656_v23  ;;  %v306_v51 = vld [vmem:[%s7030_s5 + $0x18] sm:$0xff] }
 0x81f   :  { %5808 = vmatpush3.bf16.msra.mxu0 %v7054_v27  ;;  %v5339_v3 = vpop.f32.mrb[102].mxu1 }
 0x820   :  { %5810 = vmatprep.subr.bf16.mxu0 %v5809_v26  ;;  %v3666_v32 = vpop.f32.mrb[103].mxu1 }
 0x821   :  { %v5814_v8 = vpack.c.bf16 %v5339_v3, %v3666_v32 }
 0x823   :  { %5812 = vmatpush3.bf16.msra.mxu0 %v7055_v15  ;;  %v5342_v28 = vpop.f32.mrb[104].mxu1  ;;  %5815 = vmatpush3.bf16.msra.mxu1 %v5814_v8  ;;  %v5857_v15 = vpack.c.bf16 %v306_v51, %v305_v58 }
 0x824   :  { %v3676_v60 = vpop.f32.mrb[105].mxu1  ;;  %5816 = vmatprep.subr.bf16.mxu1 %v7041_v42  ;;  %5838 = vmatprep.subr.bf16.mxu0 %v5837_v52 }
 0x825   :  { %v5817_v36 = vpack.c.bf16 %v5342_v28, %v3676_v60  ;;  %v7056_v28 = vld [vmem:[#allocation8_spill] sm:$0xff] }
 0x826   :  { %3950 = vmatmul.mubr.f32.vlgmr.msra.gmra.mrb[114].mxu0 %v2560_v53 }
 0x827   :  { %v5345_v33 = vpop.f32.mrb[106].mxu1  ;;  %5818 = vmatpush3.bf16.msra.mxu1 %v5817_v36  ;;  %5840 = vmatpush3.bf16.msra.mxu0 %v5837_v52  ;;  %v307_v36 = vld [vmem:[%s7030_s5 + $0x20] sm:$0xff] }
 0x828   :  { %v3686_v18 = vpop.f32.mrb[107].mxu1  ;;  %5819 = vmatprep.subr.bf16.mxu1 %v7041_v42 }
 0x829   :  { %v5820_v6 = vpack.c.bf16 %v5345_v33, %v3686_v18  ;;  %v308_v33 = vld [vmem:[%s7030_s5 + $0x28] sm:$0xff] }
 0x82a   :  { %v5861_v18 = vpack.c.bf16 %v308_v33, %v307_v36 }
 0x82b   :  { %v5348_v4 = vpop.f32.mrb[108].mxu1  ;;  %5821 = vmatpush3.bf16.msra.mxu1 %v5820_v6  ;;  %v309_v6 = vld [vmem:[%s7030_s5 + $0x30] sm:$0xff] }
 0x82c   :  { %v3696_v48 = vpop.f32.mrb[109].mxu1  ;;  %5822 = vmatprep.subr.bf16.mxu1 %v7041_v42 }
 0x82d   :  { %v5823_v44 = vpack.c.bf16 %v5348_v4, %v3696_v48  ;;  %v310_v4 = vld [vmem:[%s7030_s5 + $0x38] sm:$0xff] }
 0x82e   :  { %v5865_v48 = vpack.c.bf16 %v310_v4, %v309_v6 }
 0x82f   :  { %v5351_v55 = vpop.f32.mrb[110].mxu1  ;;  %5824 = vmatpush3.bf16.msra.mxu1 %v5823_v44 }
 0x830   :  { %v3706_v5 = vpop.f32.mrb[111].mxu1  ;;  %5825 = vmatprep.subr.bf16.mxu1 %v7041_v42 }
 0x831   :  { %v5826_v56 = vpack.c.bf16 %v5351_v55, %v3706_v5  ;;  %v7057_v55 = vld [vmem:[#allocation9_spill] sm:$0xff] }
 0x833   :  { %v5354_v45 = vpop.f32.mrb[112].mxu1  ;;  %5827 = vmatpush3.bf16.msra.mxu1 %v5826_v56 }
 0x834   :  { %v3716_v41 = vpop.f32.mrb[113].mxu1  ;;  %5828 = vmatprep.subr.bf16.mxu1 %v7041_v42 }
 0x835   :  { %v5829_v0 = vpack.c.bf16 %v5354_v45, %v3716_v41  ;;  %v4437_v45 = vld [vmem:[%s7031_s6] ss:$0 sm:$0xff]  ;;  %v5942_v41 = vld [vmem:[%s7025_s0 + $0x8] sm:$0xff] }
 0x837   :  { %v5357_v9 = vpop.f32.mrb[114].mxu1  ;;  %5830 = vmatpush3.bf16.msra.mxu1 %v5829_v0 }
 0x838   :  { %v3726_v17 = vpop.f32.mrb[115].mxu1  ;;  %5831 = vmatprep.subr.bf16.mxu1 %v7041_v42 }
 0x839   :  { %v5832_v53 = vpack.c.bf16 %v5357_v9, %v3726_v17  ;;  %v5943_v17 = vld [vmem:[%s7025_s0] sm:$0xff] }
 0x83b   :  { %v5360_v20 = vpop.f32.mrb[116].mxu1  ;;  %5833 = vmatpush3.bf16.msra.mxu1 %v5832_v53 }
 0x83c   :  { %v3736_v57 = vpop.f32.mrb[117].mxu1  ;;  %5834 = vmatprep.subr.bf16.mxu1 %v7041_v42  ;;  %v314_v42 = vld [vmem:[%s7030_s5 + $0x58] sm:$0xff] }
 0x83d   :  { %v5835_v47 = vpack.c.bf16 %v5360_v20, %v3736_v57  ;;  %v5841_v29 = vpack.c.bf16 %v314_v42, %v313_v25 }
 0x83f   :  { %5836 = vmatpush3.bf16.msra.mxu1 %v5835_v47  ;;  %5842 = vmatprep.subr.bf16.mxu0 %v5841_v29 }
 0x840   :  { %5844 = vmatpush3.bf16.msra.mxu0 %v5841_v29 }
 0x842   :  { %5429 = vmatmul.mubr.f32.vlgmr.msra.gmra.mrb[120].mxu1 %v6903_v37  ;;  %v315_v37 = vld [vmem:[%s7030_s5 + $0x60] sm:$0xff]  ;;  %s6000_s5 = smov [#allocation5]  }
 0x843   :  { %v5845_v21 = vpack.c.bf16 %v316_v1, %v315_v37  ;;  %s4207_s13 = sshll.u32 %s6000_s5, 4  ;;  %s4208_s13 = int_to_ptr.vmem [resolvable:$true] %s4207_s13 }
 0x844   :  { %s5966_s6 = scalar_lea.vmem %s4208_s13, 256  ;;  %p5971_p9 = scmp.lt.s32.totalorder %s4208_s13, %s4208_s13 }
 0x845   :  { %5846 = vmatprep.subr.bf16.mxu0 %v5845_v21  ;;  %p5967_p8 = scmp.ne.s32.totalorder %s4208_s13, %s5966_s6  ;;  %p5972_p10 = scmp.lt.s32.totalorder %s5966_s6, %s5966_s6 }
 0x846   :  { %5848 = vmatpush3.bf16.msra.mxu0 %v5845_v21 }
 0x847   :  { %5850 = vmatprep.subr.bf16.mxu0 %v5849_v2  ;;  %p5973_p11 = por %p5972_p10, %p5971_p9 }
 0x849   :  { %p5974_p12 = pnand %p5973_p11, %p5967_p8 }
 0x84a   :  { %5852 = vmatpush3.bf16.msra.mxu0 %v5849_v2 }
 0x84b   :  { %5854 = vmatprep.subr.bf16.mxu0 %v5853_v7 }
 0x898   :  { %v2638_v31 = vpop.xlane.xlu1 %2637 }
 0x899   :  { %v2643_v14 = vadd.f32 1e-08, %v2638_v31 }
 0x89b   :  { %5934 = vrcp.f32 %v2643_v14 }
 0x89c   :  { %v2642_v59 = vpop.xlane.xlu0 %2641 }
 0x89d   :  { %v785_v50 = vpop.xlane.xlu1 %784  ;;  %v2644_v22 = vadd.f32 1e-08, %v2642_v59 }
 0x89e   :  { %v790_v61 = vadd.f32 1e-08, %v785_v50 }
 0x8a0   :  { %5936 = vrcp.f32 %v790_v61  ;;  %v789_v39 = vpop.xlane.xlu0 %788 }
 0x8a1   :  { %5938 = vrcp.f32 %v2644_v22  ;;  %v791_v32 = vadd.f32 1e-08, %v789_v39 }
 0x8a3   :  { %5940 = vrcp.f32 %v791_v32 }
 0x8a5   :  { %v5935_v34 = vpop.eup %5934 }
 0x8aa   :  { %v5937_v23 = vpop.eup %5936 }
 0x8ab   :  { %v5939_v3 = vpop.eup %5938  ;;  %v2165_v60 = vmul.f32 %v5937_v23, %v7056_v28 }
 0x8ad   :  { %v5941_v44 = vpop.eup %5940 }
 0x8ae   :  { %v2166_v5 = vmul.f32 %v5941_v44, %v7057_v55 }
 0x8d7   :  { %v3881_v19 = vpop.f32.mrb[118].mxu1 }
 0x8d8   :  { %v5395_v12 = vpop.f32.mrb[119].mxu1 }
 0x8d9   :  { %v4816_v49 = vpop.f32.mrb[112].mxu0 }
 0x8da   :  { %v4817_v46 = vpop.f32.mrb[113].mxu0 }
 0x8db   :  { %v4818_v43 = vadd.f32 %v4817_v46, %v4816_v49 }
 0x8dd   :  { %v3882_v38 = vadd.f32 %v4818_v43, %v3881_v19 }
 0x8df   :  { %v4025_v11 = vmul.f32 %v5935_v34, %v3882_v38 }
 0x8e1   :  { %5447 = vmatprep.mubr.msk.f32.mxu0 %vm329_vm1, %v4025_v11 }
 0x8f9   :  { %v4868_v30 = vpop.f32.mrb[114].mxu0 }
 0x8fa   :  { %v4869_v35 = vpop.f32.mrb[115].mxu0 }
 0x8fb   :  { %v4870_v40 = vadd.f32 %v4869_v35, %v4868_v30 }
 0x915   :  { %v4021_v24 = vpop.f32.mrb[120].mxu1 }
 0x916   :  { %v4022_v26 = vadd.f32 %v4870_v40, %v4021_v24  ;;  %v5430_v27 = vpop.f32.mrb[121].mxu1 }
 0x918   :  { %v4026_v8 = vmul.f32 %v5939_v3, %v4022_v26 }
 0x91a   :  { %5448 = vmatmul.mubr.msk.f32.vlgmr.msra.gmra.mrb[116].mxu0 %vm329_vm1, %v4026_v8 }
 0x91b   :  { %5856 = vmatpush3.bf16.msra.mxu0 %v5853_v7  ;;  %5466 = vmatprep.mubr.msk.f32.mxu0 %vm329_vm1, %v2165_v60 }
 0x91c   :  { %5858 = vmatprep.subr.bf16.mxu0 %v5857_v15 }
 0x91f   :  { %5860 = vmatpush3.bf16.msra.mxu0 %v5857_v15 }
 0x920   :  { %5862 = vmatprep.subr.bf16.mxu0 %v5861_v18 }
 0x923   :  { %5864 = vmatpush3.bf16.msra.mxu0 %v5861_v18 }
 0x924   :  { %5866 = vmatprep.subr.bf16.mxu0 %v5865_v48 }
 0x927   :  { %5868 = vmatpush3.bf16.msra.mxu0 %v5865_v48 }
 0x92a   :  { %5467 = vmatmul.mubr.msk.f32.vlgmr.msra.gmra.mrb[116].mxu0 %vm329_vm1, %v2166_v5 }
 0x9fd   :  { %v5468_v56 = vpop.f32.mrb[116].mxu0 }
 0x9fe   :  { %v4190_v0 = vadd.f32 %v5942_v41, %v5468_v56  ;;  %v4180_v9 = vpop.f32.mrb[117].mxu0 }
 0x9ff   :  { %v4189_v53 = vadd.f32 %v5943_v17, %v4180_v9 }
 0xa00   :  { %v4199_v20 = vadd.f32 %v4437_v45, %v4190_v0 }
 0xa01   :  { %v4198_v57 = vadd.f32 %v4437_v45, %v4189_v53 }
 0xa02   :  { %4201 = vst.msk [vmem:[#allocation5 + $0x8] sm:$0xff] %vm48_vm0, %v4199_v20 }
 0xa03   :  { %4200 = vst.msk [vmem:[#allocation5] sm:$0xff] %vm48_vm0, %v4198_v57 }
 0xa04   :  { %5977 = shalt.err (!%p5974_p12)
}
 0xa05   :  { %s5978_s18 = scalar_lea.hbm %s7033_s8, 256 }
 0xa06   :  { %p5979_p13 = scmp.ne.s32.totalorder %s7033_s8, %s5978_s18  ;;  %p5982_p0 = scmp.lt.u32.totalorder %s5978_s18, %s7033_s8 }
 0xa08   :  { %p5984_p1 = pnand %p5982_p0, %p5979_p13 }
 0xa0a   :  { %5987 = shalt.err (!%p5984_p1)
}
 0xa0b   :  { %s6001_s22 = smov 128   ;;  %s6002_s7 = smov 8  }
 0xa0c   :  { %4213 = dma.vmem_to_hbm [thread:$0]  %s4208_s13, 256, %s7033_s8, [#allocation4], %s6001_s22, %s6001_s22, %s6002_s7  }
 0xa0d   :  { %5990 = dma.done.wait [#allocation4], 256  }
 0xa0e   :  { %5991 = vsyncadd [#allocation4], 4294967040 }
 0xa0f   :  { %4217 = vsyncpa [#allocation3], 1 }
 0xa10   :  { %4218 = vsyncpa [#allocation4], 1 }

</bundles_post_ra>
